<compile_context>
chip_gen: v5e
topology: v5e:2x2
jax: 0.10.0
libtpu: 0.0.40
codegen_flags: <defaults>
</compile_context>

<pallas_src>
import functools

import jax
import jax.numpy as jnp
from jax.experimental import pallas as pl
from jax.experimental.pallas import tpu as pltpu

LANES = 128


def _round_up(n, m):
    return ((n + m - 1) // m) * m


# ---------------------------------------------------------------------------
# Pallas kernel: full PPOAgent forward (encoder + fused actor/critic/heads +
# single-pass categorical log-prob / entropy) for one batch tile.
# ---------------------------------------------------------------------------
def ppo_agent_kernel(
    # streamed f32 observation tile
    x_ref,
    # resident weights (bf16) / biases (f32)
    we0, be0, we1, be1,                    # encoder hidden layers
    wac1, bac1,                            # encoder-L3 folded into fused actor/critic L1
    wac2, bac2,                            # block-diagonal actor-L2 / critic-L2
    whead, bhead,                          # fused actor heads + critic output
    # streamed int32 absolute target columns (head offsets pre-added)
    act_ref,
    # packed lane-dense output slab
    out_ref,
    *,
    actions_dim,
):
    f32 = jnp.float32
    op_dtype = whead.dtype  # MXU operand dtype (bf16); accumulation is f32

    def linear(h, w_ref, b_ref):
        # bf16 operands on the MXU, f32 accumulation; bias add + activations in f32.
        return jnp.dot(h.astype(op_dtype), w_ref[...],
                       preferred_element_type=f32) + b_ref[...]

    x = x_ref[...]  # f32 tile; cast to bf16 per MXU operand (no wrapper HBM pass)

    # ---- MLP encoder hidden layers (Linear+ReLU); output layer folded into wac1 ----
    h = jax.nn.relu(linear(x, we0, be0))
    h = jax.nn.relu(linear(h, we1, be1))

    # ---- fused actor-L1 | critic-L1 (with encoder-L3 folded in) -> [TB, 128] ----
    ac = jax.nn.relu(linear(h, wac1, bac1))
    # ---- fused block-diag actor-L2 / critic-L2               -> [TB, 128] ----
    ac = jax.nn.relu(linear(ac, wac2, bac2))
    # ---- fused heads: [logits0 | logits1 | value | 0-pad]    -> [TB, 128] ----
    head = linear(ac, whead, bhead)

    tb, lanes = out_ref.shape
    col = jax.lax.broadcasted_iota(jnp.int32, (tb, lanes), 1)

    n_logits = sum(actions_dim)
    value_col = n_logits
    lp_col = n_logits + 1
    ent_col = n_logits + 2

    valid = col < n_logits
    neg_big = jnp.float32(-1e30)

    # ---------------- single-pass multi-head softmax over the slab ----------------
    # per-head masked max (XLU), broadcast back into each head's lane segment
    masks = []
    m_bcast = jnp.zeros((tb, lanes), f32)
    off = 0
    for adim in actions_dim:
        mask = (col >= off) & (col < off + adim)
        masks.append(mask)
        m_h = jnp.max(jnp.where(mask, head, neg_big), axis=-1, keepdims=True)
        m_bcast = m_bcast + jnp.where(mask, m_h, 0.0)
        off += adim

    z = head - m_bcast                       # finite everywhere
    e = jnp.where(valid, jnp.exp(z), 0.0)    # ONE exp over the slab (EUP)

    # per-head masked sum (XLU); broadcast log(s) and 1/s back per segment
    log_s_bcast = jnp.zeros((tb, lanes), f32)
    inv_s_bcast = jnp.zeros((tb, lanes), f32)
    for mask in masks:
        s_h = jnp.sum(jnp.where(mask, e, 0.0), axis=-1, keepdims=True)
        log_s_bcast = log_s_bcast + jnp.where(mask, jnp.log(s_h), 0.0)
        # approx reciprocal only feeds the entropy term (~1e-3 rel err; fine for PPO).
        inv_s_bcast = inv_s_bcast + jnp.where(mask, pl.reciprocal(s_h, approx=True), 0.0)

    log_p = z - log_s_bcast                  # correct log_softmax on valid columns
    p = e * inv_s_bcast                      # exactly 0 outside the logit columns

    # ONE combined entropy reduction (heads are summed in the module anyway)
    ent_total = -jnp.sum(p * log_p, axis=-1, keepdims=True)

    # ONE combined log-prob reduction: targets are absolute columns (disjoint segments)
    act = act_ref[...]                       # [TB, n_heads] int32
    match = col == act[:, 0:1]
    for hi in range(1, len(actions_dim)):
        match = match | (col == act[:, hi:hi + 1])
    lp_total = jnp.sum(jnp.where(match, log_p, 0.0), axis=-1, keepdims=True)

    # Pack everything into one lane-dense slab:
    #   cols [0, n_logits)  -> per-head logits
    #   col  n_logits       -> critic value
    #   col  n_logits + 1   -> sum of log_probs
    #   col  n_logits + 2   -> sum of entropies
    slab = jnp.where(col <= value_col, head, 0.0)
    slab = slab + jnp.where(col == lp_col, lp_total, 0.0)
    slab = slab + jnp.where(col == ent_col, ent_total, 0.0)
    out_ref[...] = slab


# ---------------------------------------------------------------------------
# Weight fusion (done once, outside the kernel)
# ---------------------------------------------------------------------------
def _fuse_params(params, actions_dim, lane_width=LANES):
    (we0, be0), (we1, be1), (we2, be2) = params["encoder"]
    (wa0, ba0), (wa1, ba1) = params["actor"]
    heads = params["heads"]
    (wc0, bc0), (wc1, bc1), (wc2, bc2) = params["critic"]

    dense = wa0.shape[1]
    n_logits = sum(actions_dim)
    assert n_logits + 3 <= lane_width

    # actor-L1 | critic-L1 side by side, then fold the (linear, no-activation)
    # encoder output layer into it, in f32 (exact modulo later bf16 rounding):
    #   feat @ wac1 + bac1 = (h @ we2 + be2) @ wac1 + bac1
    #                      = h @ (we2 @ wac1) + (be2 @ wac1 + bac1)
    wac1_cat = jnp.concatenate([wa0, wc0], axis=1)         # [feat, 2*dense]
    bac1_cat = jnp.concatenate([ba0, bc0], axis=1)         # [1, 2*dense]
    wac1 = we2 @ wac1_cat                                   # [dense, 2*dense]
    bac1 = be2 @ wac1_cat + bac1_cat                        # [1, 2*dense]

    # block-diagonal actor-L2 / critic-L2
    wac2 = jnp.zeros((2 * dense, 2 * dense), jnp.float32)
    wac2 = wac2.at[:dense, :dense].set(wa1)
    wac2 = wac2.at[dense:, dense:].set(wc1)
    bac2 = jnp.concatenate([ba1, bc1], axis=1)

    # all actor heads + critic output in one lane-padded weight
    whead = jnp.zeros((2 * dense, lane_width), jnp.float32)
    bhead = jnp.zeros((1, lane_width), jnp.float32)
    off = 0
    for (wh, bh), adim in zip(heads, actions_dim):
        whead = whead.at[:dense, off:off + adim].set(wh)
        bhead = bhead.at[:, off:off + adim].set(bh)
        off += adim
    whead = whead.at[dense:, n_logits:n_logits + 1].set(wc2)
    bhead = bhead.at[:, n_logits:n_logits + 1].set(bc2)

    return [we0, be0, we1, be1, wac1, bac1, wac2, bac2, whead, bhead]


# ---------------------------------------------------------------------------
# Wrapper
# ---------------------------------------------------------------------------
def ppo_agent_forward(x, params, actions, *, actions_dim,
                      block_b=1024, mxu_dtype=jnp.bfloat16):
    """x: [B, obs_dim] f32.
    actions: list (one per head) of either [B] integer index arrays or [B, a_i] one-hot
    arrays (training path: actions provided).  Integer indices are preferred (no extra
    HBM pass)."""
    actions_dim = tuple(actions_dim)
    B, obs_dim = x.shape
    n_heads = len(actions_dim)
    n_logits = sum(actions_dim)

    # actions -> absolute target columns [B, n_heads] (head offsets pre-added)
    cols = []
    off = 0
    for a, adim in zip(actions, actions_dim):
        idx = a if a.ndim == 1 else jnp.argmax(a, axis=-1)
        cols.append(idx.astype(jnp.int32) + off)
        off += adim
    act_cols = jnp.stack(cols, axis=-1)

    fused = _fuse_params(params, actions_dim, LANES)
    # weights (even slots) -> bf16 MXU operands; biases (odd slots) stay f32
    fused = [p.astype(mxu_dtype) if i % 2 == 0 else p.astype(jnp.float32)
             for i, p in enumerate(fused)]

    # Batch tiling: fat tiles (per-grid-step overhead ~0.35 us); small batches get exactly
    # 2 grid steps so both v7x TensorCores stay busy; no padding when B already divides the
    # tile; x stays f32 into the kernel (bf16 cast happens on the VMEM operand).
    if B <= 2 * block_b:
        Bp = _round_up(B, 32)
        TB = Bp // 2 if Bp >= 32 else Bp
    else:
        TB = block_b
        Bp = _round_up(B, TB)
    if Bp != B:
        x_in = jnp.pad(x, ((0, Bp - B), (0, 0)))
        act_cols = jnp.pad(act_cols, ((0, Bp - B), (0, 0)))
    else:
        x_in = x
    grid = (Bp // TB,)

    def batch_spec(width):
        return pl.BlockSpec((TB, width), lambda i: (i, 0))

    def resident(shape):
        # constant index_map -> tensor stays resident in VMEM across all grid steps
        # TODO(synk): pipeline_mode=pl.Buffered(1) would drop the duplicate weight buffer
        #             (~100 KB); left at default buffering for portability.
        return pl.BlockSpec(shape, lambda i: (0, 0))

    in_specs = ([batch_spec(obs_dim)]
                + [resident(p.shape) for p in fused]
                + [batch_spec(n_heads)])
    out_spec = batch_spec(LANES)

    kernel = functools.partial(ppo_agent_kernel, actions_dim=actions_dim)

    slab = pl.pallas_call(
        kernel,
        grid=grid,
        in_specs=in_specs,
        out_specs=out_spec,
        # TODO(synk): if xprof shows the kernel HBM-bound on v5e, emit this slab in bf16.
        out_shape=jax.ShapeDtypeStruct((Bp, LANES), jnp.float32),
        compiler_params=pltpu.CompilerParams(
            # TODO(synk): pltpu.CORE_PARALLEL would force 2-TC sharding on v7x; PARALLEL is
            #             kept for portability across v5e/v6e single-TC chips.
            dimension_semantics=(pltpu.PARALLEL,),
            vmem_limit_bytes=32 * 1024 * 1024,  # kernel uses <4 MiB; safe on v7x's 64 MiB
        ),
    )(x_in, *fused, act_cols)

    slab = slab[:B]
    logits = []
    off = 0
    for adim in actions_dim:
        logits.append(slab[:, off:off + adim])
        off += adim
    values = slab[:, n_logits:n_logits + 1]
    logprob = slab[:, n_logits + 1:n_logits + 2]
    entropy = slab[:, n_logits + 2:n_logits + 3]

    # forward(obs, actions) returns (tuple(actions), log_prob, entropy, values); logits
    # are returned additionally for verification.
    return tuple(actions), logprob, entropy, values, logits


# ---------------------------------------------------------------------------
# Deterministic parameter construction (PyTorch-Linear-style uniform init)
# ---------------------------------------------------------------------------
def make_linear(key, in_dim, out_dim):
    kw, kb = jax.random.split(key)
    bound = 1.0 / jnp.sqrt(in_dim)
    w = jax.random.uniform(kw, (in_dim, out_dim), jnp.float32, -bound, bound)
    b = jax.random.uniform(kb, (1, out_dim), jnp.float32, -bound, bound)
    return w, b


def make_params(key, obs_dim, dense, feat, actions_dim):
    keys = iter(jax.random.split(key, 16))
    encoder = [make_linear(next(keys), obs_dim, dense),
               make_linear(next(keys), dense, dense),
               make_linear(next(keys), dense, feat)]
    actor = [make_linear(next(keys), feat, dense),
             make_linear(next(keys), dense, dense)]
    heads = [make_linear(next(keys), dense, a) for a in actions_dim]
    critic = [make_linear(next(keys), feat, dense),
              make_linear(next(keys), dense, dense),
              make_linear(next(keys), dense, 1)]
    return {"encoder": encoder, "actor": actor, "heads": heads, "critic": critic}


# ---------------------------------------------------------------------------
# Pure-JAX f32 reference (unfused, module semantics) for verification
# ---------------------------------------------------------------------------
def reference_forward(x, params, actions_onehot):
    (we0, be0), (we1, be1), (we2, be2) = params["encoder"]
    h = jax.nn.relu(x @ we0 + be0)
    h = jax.nn.relu(h @ we1 + be1)
    feat = h @ we2 + be2

    a = feat
    for w, b in params["actor"]:
        a = jax.nn.relu(a @ w + b)
    logits = [a @ w + b for (w, b) in params["heads"]]

    (wc0, bc0), (wc1, bc1), (wc2, bc2) = params["critic"]
    c = jax.nn.relu(feat @ wc0 + bc0)
    c = jax.nn.relu(c @ wc1 + bc1)
    values = c @ wc2 + bc2

    lps, ents = [], []
    for lg, act in zip(logits, actions_onehot):
        lsm = jax.nn.log_softmax(lg, axis=-1)
        p = jnp.exp(lsm)
        ents.append(-jnp.sum(p * lsm, axis=-1, keepdims=True))
        lps.append(jnp.sum(act * lsm, axis=-1, keepdims=True))
    return sum(lps), sum(ents), values, logits


if __name__ == "__main__":
    B = 256
    OBS_DIM = 32
    DENSE = 64
    FEAT = 64
    ACTIONS_DIM = (5, 3)

    key = jax.random.PRNGKey(0)
    k_obs, k_par, k_a0, k_a1 = jax.random.split(key, 4)

    obs_state = jax.random.normal(k_obs, (B, OBS_DIM), jnp.float32)
    params = make_params(k_par, OBS_DIM, DENSE, FEAT, ACTIONS_DIM)

    # deterministic actions (the "actions provided" training path); integer indices go to
    # the kernel, one-hot only for the pure-JAX reference
    idx0 = jax.random.randint(k_a0, (B,), 0, ACTIONS_DIM[0])
    idx1 = jax.random.randint(k_a1, (B,), 0, ACTIONS_DIM[1])
    actions_idx = [idx0, idx1]
    actions_onehot = [
        jax.nn.one_hot(idx0, ACTIONS_DIM[0], dtype=jnp.float32),
        jax.nn.one_hot(idx1, ACTIONS_DIM[1], dtype=jnp.float32),
    ]

    actions, logprob, entropy, values, logits = ppo_agent_forward(
        obs_state, params, actions_idx, actions_dim=ACTIONS_DIM
    )
    jax.block_until_ready((logprob, entropy, values, logits))

    # verify against pure-JAX f32 reference (kernel uses bf16 MXU operands -> loose atol)
    ref_lp, ref_ent, ref_v, ref_logits = reference_forward(
        obs_state, params, actions_onehot
    )
    assert logprob.shape == (B, 1) and entropy.shape == (B, 1) and values.shape == (B, 1)
    assert logits[0].shape == (B, ACTIONS_DIM[0]) and logits[1].shape == (B, ACTIONS_DIM[1])
    atol = 3e-2
    assert jnp.allclose(logits[0], ref_logits[0], atol=atol)
    assert jnp.allclose(logits[1], ref_logits[1], atol=atol)
    assert jnp.allclose(values, ref_v, atol=atol)
    assert jnp.allclose(logprob, ref_lp, atol=atol)
    assert jnp.allclose(entropy, ref_ent, atol=atol)

    print("KERNEL_OK")
</pallas_src>

<mosaic_0001>
module attributes {stable_mosaic.version = 11 : i64} {
  func.func @ppo_agent_kernel(%arg0: i32, %arg1: memref<128x32xf32, #tpu.memory_space<vmem>>, %arg2: memref<32x64xbf16, #tpu.memory_space<vmem>>, %arg3: memref<1x64xf32, #tpu.memory_space<vmem>>, %arg4: memref<64x64xbf16, #tpu.memory_space<vmem>>, %arg5: memref<1x64xf32, #tpu.memory_space<vmem>>, %arg6: memref<64x128xbf16, #tpu.memory_space<vmem>>, %arg7: memref<1x128xf32, #tpu.memory_space<vmem>>, %arg8: memref<128x128xbf16, #tpu.memory_space<vmem>>, %arg9: memref<1x128xf32, #tpu.memory_space<vmem>>, %arg10: memref<128x128xbf16, #tpu.memory_space<vmem>>, %arg11: memref<1x128xf32, #tpu.memory_space<vmem>>, %arg12: memref<128x2xi32, #tpu.memory_space<vmem>>, %arg13: memref<128x128xf32, #tpu.memory_space<vmem>>) attributes {dimension_semantics = [#tpu.dimension_semantics<parallel>], iteration_bounds = array<i64: 2>, scalar_prefetch = 0 : i64, scratch_operands = 0 : i64, tpu.core_type = #tpu.core_type<tc>, window_params = [{transform_indices = @transform_0, window_bounds = array<i64: 128, 32>}, {pipeline_mode = #tpu.pipeline_mode<synchronous>, transform_indices = @transform_1, window_bounds = array<i64: 32, 64>}, {pipeline_mode = #tpu.pipeline_mode<synchronous>, transform_indices = @transform_2, window_bounds = array<i64: 1, 64>}, {pipeline_mode = #tpu.pipeline_mode<synchronous>, transform_indices = @transform_3, window_bounds = array<i64: 64, 64>}, {pipeline_mode = #tpu.pipeline_mode<synchronous>, transform_indices = @transform_4, window_bounds = array<i64: 1, 64>}, {pipeline_mode = #tpu.pipeline_mode<synchronous>, transform_indices = @transform_5, window_bounds = array<i64: 64, 128>}, {pipeline_mode = #tpu.pipeline_mode<synchronous>, transform_indices = @transform_6, window_bounds = array<i64: 1, 128>}, {pipeline_mode = #tpu.pipeline_mode<synchronous>, transform_indices = @transform_7, window_bounds = array<i64: 128, 128>}, {pipeline_mode = #tpu.pipeline_mode<synchronous>, transform_indices = @transform_8, window_bounds = array<i64: 1, 128>}, {pipeline_mode = #tpu.pipeline_mode<synchronous>, transform_indices = @transform_9, window_bounds = array<i64: 128, 128>}, {pipeline_mode = #tpu.pipeline_mode<synchronous>, transform_indices = @transform_10, window_bounds = array<i64: 1, 128>}, {transform_indices = @transform_11, window_bounds = array<i64: 128, 2>}, {transform_indices = @transform_12, window_bounds = array<i64: 128, 128>}]} {
    %c0 = arith.constant 0 : index
    %c0_0 = arith.constant 0 : index
    %0 = vector.load %arg1[%c0, %c0_0] : memref<128x32xf32, #tpu.memory_space<vmem>>, vector<128x32xf32>
    %1 = arith.truncf %0 : vector<128x32xf32> to vector<128x32xbf16>
    %c0_1 = arith.constant 0 : index
    %c0_2 = arith.constant 0 : index
    %2 = vector.load %arg2[%c0_1, %c0_2] : memref<32x64xbf16, #tpu.memory_space<vmem>>, vector<32x64xbf16>
    %cst = arith.constant dense<0.000000e+00> : vector<128x64xf32>
    %3 = tpu.matmul %1, %2, %cst {dimension_numbers = #tpu.dot_dimension_numbers<[1], [0], [0], [1], [0, 0, 1, 1], [], []>} : vector<128x32xbf16>, vector<32x64xbf16>, vector<128x64xf32> -> vector<128x64xf32>
    %c0_3 = arith.constant 0 : index
    %c0_4 = arith.constant 0 : index
    %4 = vector.load %arg3[%c0_3, %c0_4] : memref<1x64xf32, #tpu.memory_space<vmem>>, vector<1x64xf32>
    %5 = vector.broadcast %4 : vector<1x64xf32> to vector<128x64xf32>
    %6 = arith.addf %3, %5 : vector<128x64xf32>
    %cst_5 = arith.constant 0.000000e+00 : f32
    %7 = vector.broadcast %cst_5 : f32 to vector<128x64xf32>
    %8 = arith.maximumf %6, %7 : vector<128x64xf32>
    %9 = arith.truncf %8 : vector<128x64xf32> to vector<128x64xbf16>
    %c0_6 = arith.constant 0 : index
    %c0_7 = arith.constant 0 : index
    %10 = vector.load %arg4[%c0_6, %c0_7] : memref<64x64xbf16, #tpu.memory_space<vmem>>, vector<64x64xbf16>
    %cst_8 = arith.constant dense<0.000000e+00> : vector<128x64xf32>
    %11 = tpu.matmul %9, %10, %cst_8 {dimension_numbers = #tpu.dot_dimension_numbers<[1], [0], [0], [1], [0, 0, 1, 1], [], []>} : vector<128x64xbf16>, vector<64x64xbf16>, vector<128x64xf32> -> vector<128x64xf32>
    %c0_9 = arith.constant 0 : index
    %c0_10 = arith.constant 0 : index
    %12 = vector.load %arg5[%c0_9, %c0_10] : memref<1x64xf32, #tpu.memory_space<vmem>>, vector<1x64xf32>
    %13 = vector.broadcast %12 : vector<1x64xf32> to vector<128x64xf32>
    %14 = arith.addf %11, %13 : vector<128x64xf32>
    %cst_11 = arith.constant 0.000000e+00 : f32
    %15 = vector.broadcast %cst_11 : f32 to vector<128x64xf32>
    %16 = arith.maximumf %14, %15 : vector<128x64xf32>
    %17 = arith.truncf %16 : vector<128x64xf32> to vector<128x64xbf16>
    %c0_12 = arith.constant 0 : index
    %c0_13 = arith.constant 0 : index
    %18 = vector.load %arg6[%c0_12, %c0_13] : memref<64x128xbf16, #tpu.memory_space<vmem>>, vector<64x128xbf16>
    %cst_14 = arith.constant dense<0.000000e+00> : vector<128x128xf32>
    %19 = tpu.matmul %17, %18, %cst_14 {dimension_numbers = #tpu.dot_dimension_numbers<[1], [0], [0], [1], [0, 0, 1, 1], [], []>} : vector<128x64xbf16>, vector<64x128xbf16>, vector<128x128xf32> -> vector<128x128xf32>
    %c0_15 = arith.constant 0 : index
    %c0_16 = arith.constant 0 : index
    %20 = vector.load %arg7[%c0_15, %c0_16] : memref<1x128xf32, #tpu.memory_space<vmem>>, vector<1x128xf32>
    %21 = vector.broadcast %20 : vector<1x128xf32> to vector<128x128xf32>
    %22 = arith.addf %19, %21 : vector<128x128xf32>
    %cst_17 = arith.constant 0.000000e+00 : f32
    %23 = vector.broadcast %cst_17 : f32 to vector<128x128xf32>
    %24 = arith.maximumf %22, %23 : vector<128x128xf32>
    %25 = arith.truncf %24 : vector<128x128xf32> to vector<128x128xbf16>
    %c0_18 = arith.constant 0 : index
    %c0_19 = arith.constant 0 : index
    %26 = vector.load %arg8[%c0_18, %c0_19] : memref<128x128xbf16, #tpu.memory_space<vmem>>, vector<128x128xbf16>
    %cst_20 = arith.constant dense<0.000000e+00> : vector<128x128xf32>
    %27 = tpu.matmul %25, %26, %cst_20 {dimension_numbers = #tpu.dot_dimension_numbers<[1], [0], [0], [1], [0, 0, 1, 1], [], []>} : vector<128x128xbf16>, vector<128x128xbf16>, vector<128x128xf32> -> vector<128x128xf32>
    %c0_21 = arith.constant 0 : index
    %c0_22 = arith.constant 0 : index
    %28 = vector.load %arg9[%c0_21, %c0_22] : memref<1x128xf32, #tpu.memory_space<vmem>>, vector<1x128xf32>
    %29 = vector.broadcast %28 : vector<1x128xf32> to vector<128x128xf32>
    %30 = arith.addf %27, %29 : vector<128x128xf32>
    %cst_23 = arith.constant 0.000000e+00 : f32
    %31 = vector.broadcast %cst_23 : f32 to vector<128x128xf32>
    %32 = arith.maximumf %30, %31 : vector<128x128xf32>
    %33 = arith.truncf %32 : vector<128x128xf32> to vector<128x128xbf16>
    %c0_24 = arith.constant 0 : index
    %c0_25 = arith.constant 0 : index
    %34 = vector.load %arg10[%c0_24, %c0_25] : memref<128x128xbf16, #tpu.memory_space<vmem>>, vector<128x128xbf16>
    %cst_26 = arith.constant dense<0.000000e+00> : vector<128x128xf32>
    %35 = tpu.matmul %33, %34, %cst_26 {dimension_numbers = #tpu.dot_dimension_numbers<[1], [0], [0], [1], [0, 0, 1, 1], [], []>} : vector<128x128xbf16>, vector<128x128xbf16>, vector<128x128xf32> -> vector<128x128xf32>
    %c0_27 = arith.constant 0 : index
    %c0_28 = arith.constant 0 : index
    %36 = vector.load %arg11[%c0_27, %c0_28] : memref<1x128xf32, #tpu.memory_space<vmem>>, vector<1x128xf32>
    %37 = vector.broadcast %36 : vector<1x128xf32> to vector<128x128xf32>
    %38 = arith.addf %35, %37 : vector<128x128xf32>
    %39 = tpu.iota {dimensions = array<i32: 1>} : vector<128x128xi32>
    %c8_i32 = arith.constant 8 : i32
    %40 = vector.broadcast %c8_i32 : i32 to vector<128x128xi32>
    %41 = arith.cmpi slt, %39, %40 : vector<128x128xi32>
    %cst_29 = arith.constant 0.000000e+00 : f32
    %42 = vector.broadcast %cst_29 : f32 to vector<128x128xf32>
    %c0_i32 = arith.constant 0 : i32
    %43 = vector.broadcast %c0_i32 : i32 to vector<128x128xi32>
    %44 = arith.cmpi sge, %39, %43 : vector<128x128xi32>
    %c5_i32 = arith.constant 5 : i32
    %45 = vector.broadcast %c5_i32 : i32 to vector<128x128xi32>
    %46 = arith.cmpi slt, %39, %45 : vector<128x128xi32>
    %47 = arith.andi %44, %46 : vector<128x128xi1>
    %cst_30 = arith.constant -1.000000e+30 : f32
    %48 = vector.broadcast %cst_30 : f32 to vector<128x128xf32>
    %49 = arith.select %47, %38, %48 : vector<128x128xi1>, vector<128x128xf32>
    %cst_31 = arith.constant dense<0xFF800000> : vector<128xf32>
    %50 = vector.multi_reduction <maximumf>, %49, %cst_31 [1] : vector<128x128xf32> to vector<128xf32>
    %51 = vector.shape_cast %50 : vector<128xf32> to vector<128x1xf32>
    %cst_32 = arith.constant 0.000000e+00 : f32
    %52 = vector.shape_cast %51 : vector<128x1xf32> to vector<128x1xf32>
    %53 = vector.broadcast %52 : vector<128x1xf32> to vector<128x128xf32>
    %54 = vector.broadcast %cst_32 : f32 to vector<128x128xf32>
    %55 = arith.select %47, %53, %54 : vector<128x128xi1>, vector<128x128xf32>
    %56 = arith.addf %42, %55 : vector<128x128xf32>
    %c5_i32_33 = arith.constant 5 : i32
    %57 = vector.broadcast %c5_i32_33 : i32 to vector<128x128xi32>
    %58 = arith.cmpi sge, %39, %57 : vector<128x128xi32>
    %c8_i32_34 = arith.constant 8 : i32
    %59 = vector.broadcast %c8_i32_34 : i32 to vector<128x128xi32>
    %60 = arith.cmpi slt, %39, %59 : vector<128x128xi32>
    %61 = arith.andi %58, %60 : vector<128x128xi1>
    %cst_35 = arith.constant -1.000000e+30 : f32
    %62 = vector.broadcast %cst_35 : f32 to vector<128x128xf32>
    %63 = arith.select %61, %38, %62 : vector<128x128xi1>, vector<128x128xf32>
    %cst_36 = arith.constant dense<0xFF800000> : vector<128xf32>
    %64 = vector.multi_reduction <maximumf>, %63, %cst_36 [1] : vector<128x128xf32> to vector<128xf32>
    %65 = vector.shape_cast %64 : vector<128xf32> to vector<128x1xf32>
    %cst_37 = arith.constant 0.000000e+00 : f32
    %66 = vector.shape_cast %65 : vector<128x1xf32> to vector<128x1xf32>
    %67 = vector.broadcast %66 : vector<128x1xf32> to vector<128x128xf32>
    %68 = vector.broadcast %cst_37 : f32 to vector<128x128xf32>
    %69 = arith.select %61, %67, %68 : vector<128x128xi1>, vector<128x128xf32>
    %70 = arith.addf %56, %69 : vector<128x128xf32>
    %71 = arith.subf %38, %70 : vector<128x128xf32>
    %72 = math.exp %71 : vector<128x128xf32>
    %cst_38 = arith.constant 0.000000e+00 : f32
    %73 = vector.broadcast %cst_38 : f32 to vector<128x128xf32>
    %74 = arith.select %41, %72, %73 : vector<128x128xi1>, vector<128x128xf32>
    %cst_39 = arith.constant 0.000000e+00 : f32
    %75 = vector.broadcast %cst_39 : f32 to vector<128x128xf32>
    %cst_40 = arith.constant 0.000000e+00 : f32
    %76 = vector.broadcast %cst_40 : f32 to vector<128x128xf32>
    %cst_41 = arith.constant 0.000000e+00 : f32
    %77 = vector.broadcast %cst_41 : f32 to vector<128x128xf32>
    %78 = arith.select %47, %74, %77 : vector<128x128xi1>, vector<128x128xf32>
    %cst_42 = arith.constant dense<0.000000e+00> : vector<128xf32>
    %79 = vector.multi_reduction <add>, %78, %cst_42 [1] : vector<128x128xf32> to vector<128xf32>
    %80 = vector.shape_cast %79 : vector<128xf32> to vector<128x1xf32>
    %81 = math.log %80 : vector<128x1xf32>
    %cst_43 = arith.constant 0.000000e+00 : f32
    %82 = vector.shape_cast %81 : vector<128x1xf32> to vector<128x1xf32>
    %83 = vector.broadcast %82 : vector<128x1xf32> to vector<128x128xf32>
    %84 = vector.broadcast %cst_43 : f32 to vector<128x128xf32>
    %85 = arith.select %47, %83, %84 : vector<128x128xi1>, vector<128x128xf32>
    %86 = arith.addf %75, %85 : vector<128x128xf32>
    %87 = tpu.reciprocal %80 {approx = true} : vector<128x1xf32> -> vector<128x1xf32>
    %cst_44 = arith.constant 0.000000e+00 : f32
    %88 = vector.shape_cast %87 : vector<128x1xf32> to vector<128x1xf32>
    %89 = vector.broadcast %88 : vector<128x1xf32> to vector<128x128xf32>
    %90 = vector.broadcast %cst_44 : f32 to vector<128x128xf32>
    %91 = arith.select %47, %89, %90 : vector<128x128xi1>, vector<128x128xf32>
    %92 = arith.addf %76, %91 : vector<128x128xf32>
    %cst_45 = arith.constant 0.000000e+00 : f32
    %93 = vector.broadcast %cst_45 : f32 to vector<128x128xf32>
    %94 = arith.select %61, %74, %93 : vector<128x128xi1>, vector<128x128xf32>
    %cst_46 = arith.constant dense<0.000000e+00> : vector<128xf32>
    %95 = vector.multi_reduction <add>, %94, %cst_46 [1] : vector<128x128xf32> to vector<128xf32>
    %96 = vector.shape_cast %95 : vector<128xf32> to vector<128x1xf32>
    %97 = math.log %96 : vector<128x1xf32>
    %cst_47 = arith.constant 0.000000e+00 : f32
    %98 = vector.shape_cast %97 : vector<128x1xf32> to vector<128x1xf32>
    %99 = vector.broadcast %98 : vector<128x1xf32> to vector<128x128xf32>
    %100 = vector.broadcast %cst_47 : f32 to vector<128x128xf32>
    %101 = arith.select %61, %99, %100 : vector<128x128xi1>, vector<128x128xf32>
    %102 = arith.addf %86, %101 : vector<128x128xf32>
    %103 = tpu.reciprocal %96 {approx = true} : vector<128x1xf32> -> vector<128x1xf32>
    %cst_48 = arith.constant 0.000000e+00 : f32
    %104 = vector.shape_cast %103 : vector<128x1xf32> to vector<128x1xf32>
    %105 = vector.broadcast %104 : vector<128x1xf32> to vector<128x128xf32>
    %106 = vector.broadcast %cst_48 : f32 to vector<128x128xf32>
    %107 = arith.select %61, %105, %106 : vector<128x128xi1>, vector<128x128xf32>
    %108 = arith.addf %92, %107 : vector<128x128xf32>
    %109 = arith.subf %71, %102 : vector<128x128xf32>
    %110 = arith.mulf %74, %108 : vector<128x128xf32>
    %111 = arith.mulf %110, %109 : vector<128x128xf32>
    %cst_49 = arith.constant dense<0.000000e+00> : vector<128xf32>
    %112 = vector.multi_reduction <add>, %111, %cst_49 [1] : vector<128x128xf32> to vector<128xf32>
    %113 = vector.shape_cast %112 : vector<128xf32> to vector<128x1xf32>
    %cst_50 = arith.constant 0.000000e+00 : f32
    %114 = vector.broadcast %cst_50 : f32 to vector<128x1xf32>
    %115 = arith.subf %114, %113 : vector<128x1xf32>
    %c0_51 = arith.constant 0 : index
    %c0_52 = arith.constant 0 : index
    %116 = vector.load %arg12[%c0_51, %c0_52] : memref<128x2xi32, #tpu.memory_space<vmem>>, vector<128x2xi32>
    %117 = vector.extract_strided_slice %116 {offsets = [0, 0], sizes = [128, 1], strides = [1, 1]} : vector<128x2xi32> to vector<128x1xi32>
    %118 = vector.broadcast %117 : vector<128x1xi32> to vector<128x128xi32>
    %119 = arith.cmpi eq, %39, %118 : vector<128x128xi32>
    %120 = vector.extract_strided_slice %116 {offsets = [0, 1], sizes = [128, 1], strides = [1, 1]} : vector<128x2xi32> to vector<128x1xi32>
    %121 = vector.broadcast %120 : vector<128x1xi32> to vector<128x128xi32>
    %122 = arith.cmpi eq, %39, %121 : vector<128x128xi32>
    %123 = arith.ori %119, %122 : vector<128x128xi1>
    %cst_53 = arith.constant 0.000000e+00 : f32
    %124 = vector.broadcast %cst_53 : f32 to vector<128x128xf32>
    %125 = arith.select %123, %109, %124 : vector<128x128xi1>, vector<128x128xf32>
    %cst_54 = arith.constant dense<0.000000e+00> : vector<128xf32>
    %126 = vector.multi_reduction <add>, %125, %cst_54 [1] : vector<128x128xf32> to vector<128xf32>
    %127 = vector.shape_cast %126 : vector<128xf32> to vector<128x1xf32>
    %c8_i32_55 = arith.constant 8 : i32
    %128 = vector.broadcast %c8_i32_55 : i32 to vector<128x128xi32>
    %129 = arith.cmpi sle, %39, %128 : vector<128x128xi32>
    %cst_56 = arith.constant 0.000000e+00 : f32
    %130 = vector.broadcast %cst_56 : f32 to vector<128x128xf32>
    %131 = arith.select %129, %38, %130 : vector<128x128xi1>, vector<128x128xf32>
    %c9_i32 = arith.constant 9 : i32
    %132 = vector.broadcast %c9_i32 : i32 to vector<128x128xi32>
    %133 = arith.cmpi eq, %39, %132 : vector<128x128xi32>
    %cst_57 = arith.constant 0.000000e+00 : f32
    %134 = vector.shape_cast %127 : vector<128x1xf32> to vector<128x1xf32>
    %135 = vector.broadcast %134 : vector<128x1xf32> to vector<128x128xf32>
    %136 = vector.broadcast %cst_57 : f32 to vector<128x128xf32>
    %137 = arith.select %133, %135, %136 : vector<128x128xi1>, vector<128x128xf32>
    %138 = arith.addf %131, %137 : vector<128x128xf32>
    %c10_i32 = arith.constant 10 : i32
    %139 = vector.broadcast %c10_i32 : i32 to vector<128x128xi32>
    %140 = arith.cmpi eq, %39, %139 : vector<128x128xi32>
    %cst_58 = arith.constant 0.000000e+00 : f32
    %141 = vector.shape_cast %115 : vector<128x1xf32> to vector<128x1xf32>
    %142 = vector.broadcast %141 : vector<128x1xf32> to vector<128x128xf32>
    %143 = vector.broadcast %cst_58 : f32 to vector<128x128xf32>
    %144 = arith.select %140, %142, %143 : vector<128x128xi1>, vector<128x128xf32>
    %145 = arith.addf %138, %144 : vector<128x128xf32>
    %c0_59 = arith.constant 0 : index
    %c0_60 = arith.constant 0 : index
    %146 = vector.load %arg13[%c0_59, %c0_60] : memref<128x128xf32, #tpu.memory_space<vmem>>, vector<128x128xf32>
    tpu.vector_store %arg13[%c0_59, %c0_60], %145 {strides = array<i32>} : memref<128x128xf32, #tpu.memory_space<vmem>>, vector<128x128xf32>,
    return
  }
  func.func @transform_0(%arg0: i32) -> (i32, i32) {
    %c0_i32 = arith.constant 0 : i32
    %c0_i32_0 = arith.constant 0 : i32
    return %arg0, %c0_i32 : i32, i32
  }
  func.func @transform_1(%arg0: i32) -> (i32, i32) {
    %c0_i32 = arith.constant 0 : i32
    %c0_i32_0 = arith.constant 0 : i32
    %c0_i32_1 = arith.constant 0 : i32
    return %c0_i32, %c0_i32_0 : i32, i32
  }
  func.func @transform_2(%arg0: i32) -> (i32, i32) {
    %c0_i32 = arith.constant 0 : i32
    %c0_i32_0 = arith.constant 0 : i32
    %c0_i32_1 = arith.constant 0 : i32
    return %c0_i32, %c0_i32_0 : i32, i32
  }
  func.func @transform_3(%arg0: i32) -> (i32, i32) {
    %c0_i32 = arith.constant 0 : i32
    %c0_i32_0 = arith.constant 0 : i32
    %c0_i32_1 = arith.constant 0 : i32
    return %c0_i32, %c0_i32_0 : i32, i32
  }
  func.func @transform_4(%arg0: i32) -> (i32, i32) {
    %c0_i32 = arith.constant 0 : i32
    %c0_i32_0 = arith.constant 0 : i32
    %c0_i32_1 = arith.constant 0 : i32
    return %c0_i32, %c0_i32_0 : i32, i32
  }
  func.func @transform_5(%arg0: i32) -> (i32, i32) {
    %c0_i32 = arith.constant 0 : i32
    %c0_i32_0 = arith.constant 0 : i32
    %c0_i32_1 = arith.constant 0 : i32
    return %c0_i32, %c0_i32_0 : i32, i32
  }
  func.func @transform_6(%arg0: i32) -> (i32, i32) {
    %c0_i32 = arith.constant 0 : i32
    %c0_i32_0 = arith.constant 0 : i32
    %c0_i32_1 = arith.constant 0 : i32
    return %c0_i32, %c0_i32_0 : i32, i32
  }
  func.func @transform_7(%arg0: i32) -> (i32, i32) {
    %c0_i32 = arith.constant 0 : i32
    %c0_i32_0 = arith.constant 0 : i32
    %c0_i32_1 = arith.constant 0 : i32
    return %c0_i32, %c0_i32_0 : i32, i32
  }
  func.func @transform_8(%arg0: i32) -> (i32, i32) {
    %c0_i32 = arith.constant 0 : i32
    %c0_i32_0 = arith.constant 0 : i32
    %c0_i32_1 = arith.constant 0 : i32
    return %c0_i32, %c0_i32_0 : i32, i32
  }
  func.func @transform_9(%arg0: i32) -> (i32, i32) {
    %c0_i32 = arith.constant 0 : i32
    %c0_i32_0 = arith.constant 0 : i32
    %c0_i32_1 = arith.constant 0 : i32
    return %c0_i32, %c0_i32_0 : i32, i32
  }
  func.func @transform_10(%arg0: i32) -> (i32, i32) {
    %c0_i32 = arith.constant 0 : i32
    %c0_i32_0 = arith.constant 0 : i32
    %c0_i32_1 = arith.constant 0 : i32
    return %c0_i32, %c0_i32_0 : i32, i32
  }
  func.func @transform_11(%arg0: i32) -> (i32, i32) {
    %c0_i32 = arith.constant 0 : i32
    %c0_i32_0 = arith.constant 0 : i32
    return %arg0, %c0_i32 : i32, i32
  }
  func.func @transform_12(%arg0: i32) -> (i32, i32) {
    %c0_i32 = arith.constant 0 : i32
    %c0_i32_0 = arith.constant 0 : i32
    return %arg0, %c0_i32 : i32, i32
  }
}

</mosaic_0001>

<bundles_post_ra>
// kernel: tpu_custom_call.1
= control target key start
LH: loop header
LB: loop body
LE: loop exit
PB: predicated region body
PF: predicated region fallthrough
CT: control target
= control target key end

     0   :  { %s3919_s0 = inlined_call_operand.vmem [shape: f32[256,32], index: 0, kind: input, shape index: {}]   ;;  %s3920_s1 = inlined_call_operand.vmem [shape: bf16[32,64], index: 1, kind: input, shape index: {}]   ;;  %s3921_s2 = inlined_call_operand.vmem [shape: f32[1,64], index: 2, kind: input, shape index: {}]   ;;  %s3922_s3 = inlined_call_operand.vmem [shape: bf16[64,64], index: 3, kind: input, shape index: {}]   ;;  %s3923_s4 = inlined_call_operand.vmem [shape: f32[1,64], index: 4, kind: input, shape index: {}]   ;;  %s3924_s5 = inlined_call_operand.vmem [shape: bf16[64,128], index: 5, kind: input, shape index: {}]   ;;  %s3925_s6 = inlined_call_operand.vmem [shape: f32[1,128], index: 6, kind: input, shape index: {}]   ;;  %s3926_s7 = inlined_call_operand.vmem [shape: bf16[128,128], index: 7, kind: input, shape index: {}]   ;;  %s3927_s8 = inlined_call_operand.vmem [shape: f32[1,128], index: 8, kind: input, shape index: {}]   ;;  %s3928_s9 = inlined_call_operand.vmem [shape: bf16[128,128], index: 9, kind: input, shape index: {}]   ;;  %s3929_s10 = inlined_call_operand.vmem [shape: f32[1,128], index: 10, kind: input, shape index: {}]   ;;  %s3930_s11 = inlined_call_operand.vmem [shape: s32[256,2], index: 11, kind: input, shape index: {}]   ;;  %s3931_s12 = inlined_call_operand.hbm [shape: f32[256,128], index: 12, kind: output, shape index: {}]  }
   0x1   :  { %3952 = sst [smem:[#allocation27_spill]] %s3919_s0 }
   0x2   :  { %3953 = sst [smem:[#allocation28_spill]] %s3920_s1 }
   0x3   :  { %17 = vsyncpa [#allocation3], 0 }
   0x4   :  { %19 = vsyncpa [#allocation3 + $0x1], 0  ;;  %s2672_s21 = smov 0   ;;  %s2674_s22 = smov 0  }
   0x5   :  { %s2676_s23 = smov 0   ;;  %s2678_s24 = smov 0  }
   0x6 LB: > { %s2693_s25 = sadd.s32 4294967295, %s2601_s24   ;;  %s2150_s26 = sadd.s32 4294967294, %s2601_s24   ;;  %s2601_s24 = sphi %s2678_s24, %s4122_s24   ;;  %s2597_s23 = sphi %s2676_s23, %s4121_s23   ;;  %s2593_s22 = sphi %s2674_s22, %s4120_s22   ;;  %s2589_s21 = sphi %s2672_s21, %s4119_s21  }
   0x7   : > { %s2697_s27 = sadd.s32 1, %s2601_s24   ;;  %s294_s28 = sadd.s32 1, %s2597_s23 }
   0x8   : > { %s291_s29 = ssub.s32 %s2601_s24, %s2697_s27  ;;  %p304_p0 = scmp.ne.s32.totalorder %s2597_s23, %s2593_s22 }
   0x9   : > { %p292_p1 = scmp.eq.s32.totalorder %s291_s29, 0  ;;  %p305_p2 = scmp.eq.s32.totalorder %s2693_s25, 1 }
   0xa   : > { %p310_p3 = scmp.ne.s32.totalorder %s2593_s22, %s2589_s21  ;;  %p311_p4 = scmp.eq.s32.totalorder %s2150_s26, 1 }
   0xb   : > { %s2708_s30 = scalar_select %p292_p1, %s2597_s23, %s294_s28  }
   0xc   : > { %p2710_p5 = por %p305_p2, %p304_p0  ;;  %p2714_p6 = por %p311_p4, %p310_p3 }
   0xd   : > { %p2153_p7 = scmp.ge.s32.totalorder %s2601_s24, 1  ;;  %p377_p8 = scmp.lt.s32.totalorder %s2601_s24, 3 }
   0xf   : > { %p378_p9 = pnand %p2153_p7, %p377_p8 }
  0x11   : > { %381 = sbr.rel (%p378_p9) target bundleno = 1256 (0x4e8), region = 68 }
  0x16   : > { %s3956_s1 = sld [smem:[#allocation28_spill]]  ;;  %s2155_s17 = sshll.u32 %s2693_s25, 4  ;;  %vm482_vm0 = vcmask 261120   ;;  %v2297_v11 = vld [vmem:[%s3922_s3 + $0x18] sm:$0xff]  ;;  %v2296_v15 = vld [vmem:[%s3922_s3 + $0x10] sm:$0xff]  ;;  %v2295_v16 = vld [vmem:[%s3922_s3 + $0x8] sm:$0xff] }
  0x17   : > { %p425_p10 = scmp.lt.s32.totalorder %s2155_s17, 31  ;;  %s3957_s0 = sld [smem:[#allocation27_spill]]  ;;  %v2294_v29 = vld [vmem:[%s3922_s3] sm:$0xff]  ;;  %vm616_vm1 = vcmask 523264  }
  0x18   : > { %v2776_v31 = vld [vmem:[%s3921_s2] ss:$0 sm:$0xff]  ;;  %s421_s16 = sand.u32 1, %s2593_s22  }
  0x19   : > { %s4124_s17 = smov (!%p425_p10, %s2155_s17), 31  ;;  %s2154_s18 = sshll.u32 %s421_s16, 7 }
  0x1a   : > { %s2156_s20 = sshll.u32 %s4124_s17, 3  ;;  %s3757_s19 = scalar_lea.vmem [#allocation2], %s2154_s18 }
  0x1b   : > { %s2886_s28 = scalar_lea.vmem %s3930_s11, %s2156_s20 }
  0x1c   : > { %v2293_v0 = vld [vmem:[%s3956_s1 + $0x8] sm:$0xff]  ;;  %v2292_v1 = vld [vmem:[%s3956_s1] sm:$0xff] }
  0x1d   : > { %513 = vmatpush.bf16.msra.mxu0 %v2293_v0  ;;  %2319 = vmatpush.bf16.msra.mxu1 %v2293_v0  ;;  %s2735_s29 = scalar_lea.vmem %s3957_s0, %s2156_s20 }
  0x1e   : > { %2320 = vmatpush.bf16.msra.mxu2 %v2293_v0  ;;  %2321 = vmatpush.bf16.msra.mxu3 %v2293_v0  ;;  %v438_v2 = vld [vmem:[%s2735_s29] sm:$0xff]  ;;  %v439_v3 = vld [vmem:[%s2735_s29 + $0x8] sm:$0xff]  ;;  %v448_v8 = vld [vmem:[%s2735_s29 + $0x50] sm:$0xff] }
  0x1f   : > { %v454_v4 = vpack.c.bf16 %v439_v3, %v438_v2  ;;  %v442_v5 = vld [vmem:[%s2735_s29 + $0x20] sm:$0xff]  ;;  %v443_v6 = vld [vmem:[%s2735_s29 + $0x28] sm:$0xff]  ;;  %v449_v9 = vld [vmem:[%s2735_s29 + $0x58] sm:$0xff] }
  0x20   : > { %v456_v7 = vpack.c.bf16 %v443_v6, %v442_v5  ;;  %v459_v10 = vpack.c.bf16 %v449_v9, %v448_v8  ;;  %v452_v12 = vld [vmem:[%s2735_s29 + $0x70] sm:$0xff]  ;;  %v453_v13 = vld [vmem:[%s2735_s29 + $0x78] sm:$0xff]  ;;  %v450_v23 = vld [vmem:[%s2735_s29 + $0x60] sm:$0xff] }
  0x21   : > { %514 = vmatpush.bf16.msra.mxu0 %v2292_v1  ;;  %2322 = vmatpush.bf16.msra.mxu1 %v2292_v1  ;;  %v461_v14 = vpack.c.bf16 %v453_v13, %v452_v12  ;;  %v440_v17 = vld [vmem:[%s2735_s29 + $0x10] sm:$0xff]  ;;  %v441_v18 = vld [vmem:[%s2735_s29 + $0x18] sm:$0xff]  ;;  %v451_v24 = vld [vmem:[%s2735_s29 + $0x68] sm:$0xff] }
  0x22   : > { %2323 = vmatpush.bf16.msra.mxu2 %v2292_v1  ;;  %2324 = vmatpush.bf16.msra.mxu3 %v2292_v1  ;;  %v444_v19 = vld [vmem:[%s2735_s29 + $0x30] sm:$0xff]  ;;  %v445_v20 = vld [vmem:[%s2735_s29 + $0x38] sm:$0xff]  ;;  %v455_v21 = vpack.c.bf16 %v441_v18, %v440_v17  ;;  %v460_v25 = vpack.c.bf16 %v451_v24, %v450_v23  ;;  %v446_v26 = vld [vmem:[%s2735_s29 + $0x40] sm:$0xff] }
  0x23   : > { %v457_v22 = vpack.c.bf16 %v445_v20, %v444_v19  ;;  %v447_v27 = vld [vmem:[%s2735_s29 + $0x48] sm:$0xff]  ;;  %v2298_v20 = vld [vmem:[%s3924_s5] sm:$0xff]  ;;  %s2318_s29 = sshll.u32 %s2693_s25, 7  ;;  %s2061_s25 = scalar_lea.sflag [#allocation3], %s421_s16 }
  0x24   : > { %2167 = vmatmul.msk.bf16.vlgmr.msra.gmra.mxu0 %vm482_vm0, %v454_v4  ;;  %2169 = vmatmul.msk.bf16.vlgmr.msra.gmra.mxu1 %vm482_vm0, %v456_v7  ;;  %v458_v28 = vpack.c.bf16 %v447_v27, %v446_v26  ;;  %v2301_v4 = vld [vmem:[%s3924_s5 + $0x18] sm:$0xff]  ;;  %v2299_v12 = vld [vmem:[%s3924_s5 + $0x8] sm:$0xff]  ;;  %s2072_s20 = scalar_lea.hbm %s3931_s12, %s2318_s29 }
  0x25   : > { %2172 = vmatmul.msk.bf16.vlgmr.msra.gmra.mxu2 %vm482_vm0, %v459_v10  ;;  %645 = vmatpush.bf16.msrb.mxu1 %v2297_v11  ;;  %v2300_v11 = vld [vmem:[%s3924_s5 + $0x10] sm:$0xff]  ;;  %s2075_s15 = sshll.u32 %s2072_s20, 4  ;;  %s2559_s20 = scalar_lea.hbm %s3931_s12, 256  ;;  %s2076_s15 = int_to_ptr.hbm [resolvable:$true] %s2075_s15 }
  0x26   : > { %2174 = vmatmul.msk.bf16.vlgmr.msra.gmra.mxu3 %vm482_vm0, %v461_v14  ;;  %778 = vmatpush.bf16.msrb.mxu2 %v2301_v4  ;;  %s2553_s18 = sshra.s32 %s2076_s15, 4  ;;  %s2554_s18 = int_to_ptr.hbm [resolvable:$true] %s2553_s18 }
  0x27   : > { %s2555_s29 = scalar_lea.hbm %s2554_s18, 128  ;;  %p2560_p0 = scmp.lt.s32.totalorder %s2554_s18, %s3931_s12 }
  0x28   : > { %p2556_p11 = scmp.ne.s32.totalorder %s2554_s18, %s2555_s29  ;;  %p2561_p1 = scmp.lt.s32.totalorder %s2559_s20, %s2555_s29 }
  0x29   : > { %646 = vmatpush.bf16.msrb.mxu1 %v2296_v15 }
  0x2a   : > { %779 = vmatpush.bf16.msrb.mxu2 %v2300_v11  ;;  %p2557_p12 = pnand %p2556_p11, %p2710_p5  ;;  %p2562_p2 = por %p2561_p1, %p2560_p0 }
  0x2c   : > { %p2558_p13 = pneg %p2557_p12 }
  0x2d   : > { %647 = vmatpush.bf16.msrb.mxu1 %v2295_v16 }
  0x2e   : > { %780 = vmatpush.bf16.msrb.mxu2 %v2299_v12  ;;  %p2563_p3 = pnand %p2562_p2, %p2558_p13 }
  0x31   : > { %648 = vmatpush.bf16.msrb.mxu1 %v2294_v29 }
  0x32   : > { %781 = vmatpush.bf16.msrb.mxu2 %v2298_v20 }
  0x34   : > { %2168 = vmatmul.msk.bf16.gmra.mxu0 %vm482_vm0, %v455_v21  ;;  %2170 = vmatmul.msk.bf16.gmra.mxu1 %vm482_vm0, %v457_v22 }
  0x35   : > { %2173 = vmatmul.msk.bf16.gmra.mxu2 %vm482_vm0, %v460_v25 }
  0x44   : > { %2171 = vmatmul.msk.bf16.gmra.mxu1 %vm482_vm0, %v458_v28  ;;  %v2817_v28 = vld [vmem:[%s3923_s4] ss:$0 sm:$0xff] }
  0xa1   : > { %v516_v30 = vpop.f32.mrf.mxu0  ;;  %v526_v39 = vpop.f32.mrf.mxu1 }
  0xa2   : > { %v517_v32 = vadd.f32 %v2776_v31, %v516_v30  ;;  %v527_v48 = vadd.f32 %v2776_v31, %v526_v39 }
  0xa4   : > { %v556_v35 = vmax.f32 %v517_v32, 0.0  ;;  %v560_v50 = vmax.f32 %v527_v48, 0.0 }
  0xa8   : > { %v541_v61 = vpop.f32.mrf.mxu2 }
  0xa9   : > { %v518_v33 = vpop.f32.mrf.mxu0  ;;  %v528_v43 = vpop.f32.mrf.mxu1  ;;  %v542_v5 = vadd.f32 %v2776_v31, %v541_v61 }
  0xaa   : > { %v519_v34 = vadd.f32 %v2776_v31, %v518_v33  ;;  %v529_v49 = vadd.f32 %v2776_v31, %v528_v43  ;;  %v551_v16 = vpop.f32.mrf.mxu3 }
  0xab   : > { %v566_v8 = vmax.f32 %v542_v5, 0.0  ;;  %v552_v22 = vadd.f32 %v2776_v31, %v551_v16 }
  0xac   : > { %v557_v36 = vmax.f32 %v519_v34, 0.0  ;;  %v561_v51 = vmax.f32 %v529_v49, 0.0 }
  0xad   : > { %v570_v24 = vmax.f32 %v552_v22, 0.0  ;;  %v2303_v22 = vld [vmem:[%s3926_s7 + $0x8] sm:$0xff] }
  0xae   : > { %v572_v37 = vpack.c.bf16 %v557_v36, %v556_v35  ;;  %v574_v52 = vpack.c.bf16 %v561_v51, %v560_v50 }
  0xb0   : > { %2191 = vmatmul.msk.bf16.vlgmr.msrb.gmra.mxu1 %vm616_vm1, %v572_v37  ;;  %v543_v3 = vpop.f32.mrf.mxu2 }
  0xb1   : > { %v521_v38 = vpop.f32.mrf.mxu0  ;;  %v531_v47 = vpop.f32.mrf.mxu1  ;;  %v544_v6 = vadd.f32 %v2776_v31, %v543_v3 }
  0xb2   : > { %v522_v40 = vadd.f32 %v2776_v31, %v521_v38  ;;  %v532_v54 = vadd.f32 %v2776_v31, %v531_v47  ;;  %v553_v21 = vpop.f32.mrf.mxu3 }
  0xb3   : > { %v567_v9 = vmax.f32 %v544_v6, 0.0  ;;  %v554_v23 = vadd.f32 %v2776_v31, %v553_v21  ;;  %v2309_v6 = vld [vmem:[%s3926_s7 + $0x38] sm:$0xff] }
  0xb4   : > { %v558_v44 = vmax.f32 %v522_v40, 0.0  ;;  %v562_v57 = vmax.f32 %v532_v54, 0.0  ;;  %915 = vmatpush.bf16.msrb.mxu3 %v2309_v6 }
  0xb5   : > { %v577_v10 = vpack.c.bf16 %v567_v9, %v566_v8  ;;  %v571_v25 = vmax.f32 %v554_v23, 0.0  ;;  %v2308_v8 = vld [vmem:[%s3926_s7 + $0x30] sm:$0xff]  ;;  %v2307_v9 = vld [vmem:[%s3926_s7 + $0x28] sm:$0xff] }
  0xb7   : > { %v579_v26 = vpack.c.bf16 %v571_v25, %v570_v24 }
  0xb8   : > { %v546_v7 = vpop.f32.mrf.mxu2  ;;  %916 = vmatpush.bf16.msrb.mxu3 %v2308_v8 }
  0xb9   : > { %v523_v41 = vpop.f32.mrf.mxu0  ;;  %v533_v53 = vpop.f32.mrf.mxu1  ;;  %v547_v14 = vadd.f32 %v2776_v31, %v546_v7 }
  0xba   : > { %v524_v42 = vadd.f32 %v2776_v31, %v523_v41  ;;  %v534_v55 = vadd.f32 %v2776_v31, %v533_v53 }
  0xbb   : > { %v568_v17 = vmax.f32 %v547_v14, 0.0 }
  0xbc   : > { %v559_v45 = vmax.f32 %v524_v42, 0.0  ;;  %v563_v58 = vmax.f32 %v534_v55, 0.0  ;;  %917 = vmatpush.bf16.msrb.mxu3 %v2307_v9  ;;  %v2897_v9 = vld [vmem:[%s2886_s28 + $0x10] sm:$0xff] }
  0xbe   : > { %v573_v46 = vpack.c.bf16 %v559_v45, %v558_v44  ;;  %v575_v59 = vpack.c.bf16 %v563_v58, %v562_v57 }
  0xc0   : > { %2192 = vmatmul.msk.bf16.gmra.mxu1 %vm616_vm1, %v573_v46  ;;  %v548_v13 = vpop.f32.mrf.mxu2 }
  0xc1   : > { %v536_v56 = vpop.f32.mrf.mxu1  ;;  %v549_v15 = vadd.f32 %v2776_v31, %v548_v13  ;;  %v2306_v13 = vld [vmem:[%s3926_s7 + $0x20] sm:$0xff] }
  0xc2   : > { %v537_v62 = vadd.f32 %v2776_v31, %v536_v56  ;;  %918 = vmatpush.bf16.msrb.mxu3 %v2306_v13  ;;  %v1753_v13 = vld [vmem:[%s2886_s28] sm:$0xff] }
  0xc3   : > { %v569_v18 = vmax.f32 %v549_v15, 0.0 }
  0xc4   : > { %v564_v0 = vmax.f32 %v537_v62, 0.0 }
  0xc5   : > { %v578_v19 = vpack.c.bf16 %v569_v18, %v568_v17  ;;  %v2305_v18 = vld [vmem:[%s3926_s7 + $0x18] sm:$0xff] }
  0xc6   : > { %919 = vmatpush.bf16.msrb.mxu3 %v2305_v18  ;;  %v2315_v18 = vld [vmem:[%s3928_s9 + $0x28] sm:$0xff] }
  0xc9   : > { %v538_v60 = vpop.f32.mrf.mxu1 }
  0xca   : > { %v539_v63 = vadd.f32 %v2776_v31, %v538_v60 }
  0xcc   : > { %v565_v1 = vmax.f32 %v539_v63, 0.0 }
  0xce   : > { %v576_v2 = vpack.c.bf16 %v565_v1, %v564_v0 }
  0xd0   : > { %2193 = vmatmul.msk.bf16.gmra.mxu1 %vm616_vm1, %v574_v52 }
  0xe0   : > { %2194 = vmatmul.msk.bf16.gmra.mxu1 %vm616_vm1, %v575_v59 }
  0xf0   : > { %2195 = vmatmul.msk.bf16.gmra.mxu1 %vm616_vm1, %v576_v2 }
 0x100   : > { %2196 = vmatmul.msk.bf16.gmra.mxu1 %vm616_vm1, %v577_v10 }
 0x110   : > { %2197 = vmatmul.msk.bf16.gmra.mxu1 %vm616_vm1, %v578_v19  ;;  %v2304_v19 = vld [vmem:[%s3926_s7 + $0x10] sm:$0xff] }
 0x111   : > { %920 = vmatpush.bf16.msrb.mxu3 %v2304_v19  ;;  %v1756_v19 = vld [vmem:[%s2886_s28 + $0x18] sm:$0xff] }
 0x115   : > { %921 = vmatpush.bf16.msrb.mxu3 %v2303_v22 }
 0x120   : > { %2198 = vmatmul.msk.bf16.gmra.mxu1 %vm616_vm1, %v579_v26  ;;  %v2302_v26 = vld [vmem:[%s3926_s7] sm:$0xff] }
 0x121   : > { %922 = vmatpush.bf16.msrb.mxu3 %v2302_v26 }
 0x12d   : > { %v650_v27 = vpop.f32.mrf.mxu1 }
 0x12e   : > { %v651_v29 = vadd.f32 %v2817_v28, %v650_v27 }
 0x130   : > { %v690_v33 = vmax.f32 %v651_v29, 0.0 }
 0x135   : > { %v652_v30 = vpop.f32.mrf.mxu1 }
 0x136   : > { %v653_v32 = vadd.f32 %v2817_v28, %v652_v30  ;;  %v2870_v30 = vld [vmem:[%s3925_s6] ss:$0 sm:$0xff] }
 0x138   : > { %v691_v34 = vmax.f32 %v653_v32, 0.0 }
 0x13a   : > { %v706_v35 = vpack.c.bf16 %v691_v34, %v690_v33 }
 0x13c   : > { %2215 = vmatmul.msk.bf16.vlgmr.msrb.gmra.mxu2 %vm616_vm1, %v706_v35 }
 0x13d   : > { %v655_v31 = vpop.f32.mrf.mxu1 }
 0x13e   : > { %v656_v36 = vadd.f32 %v2817_v28, %v655_v31 }
 0x140   : > { %v692_v39 = vmax.f32 %v656_v36, 0.0 }
 0x145   : > { %v657_v37 = vpop.f32.mrf.mxu1 }
 0x146   : > { %v658_v38 = vadd.f32 %v2817_v28, %v657_v37 }
 0x148   : > { %v693_v40 = vmax.f32 %v658_v38, 0.0 }
 0x14a   : > { %v707_v41 = vpack.c.bf16 %v693_v40, %v692_v39 }
 0x14c   : > { %2216 = vmatmul.msk.bf16.gmra.mxu2 %vm616_vm1, %v707_v41 }
 0x14d   : > { %v660_v42 = vpop.f32.mrf.mxu1 }
 0x14e   : > { %v661_v43 = vadd.f32 %v2817_v28, %v660_v42 }
 0x150   : > { %v694_v46 = vmax.f32 %v661_v43, 0.0 }
 0x155   : > { %v662_v44 = vpop.f32.mrf.mxu1 }
 0x156   : > { %v663_v45 = vadd.f32 %v2817_v28, %v662_v44 }
 0x158   : > { %v695_v47 = vmax.f32 %v663_v45, 0.0 }
 0x15a   : > { %v708_v48 = vpack.c.bf16 %v695_v47, %v694_v46 }
 0x15c   : > { %2217 = vmatmul.msk.bf16.gmra.mxu2 %vm616_vm1, %v708_v48 }
 0x15d   : > { %v665_v49 = vpop.f32.mrf.mxu1 }
 0x15e   : > { %v666_v50 = vadd.f32 %v2817_v28, %v665_v49 }
 0x160   : > { %v696_v53 = vmax.f32 %v666_v50, 0.0 }
 0x165   : > { %v667_v51 = vpop.f32.mrf.mxu1 }
 0x166   : > { %v668_v52 = vadd.f32 %v2817_v28, %v667_v51 }
 0x168   : > { %v697_v54 = vmax.f32 %v668_v52, 0.0 }
 0x16a   : > { %v709_v55 = vpack.c.bf16 %v697_v54, %v696_v53 }
 0x16c   : > { %2218 = vmatmul.msk.bf16.gmra.mxu2 %vm616_vm1, %v709_v55 }
 0x16d   : > { %v670_v56 = vpop.f32.mrf.mxu1 }
 0x16e   : > { %v671_v57 = vadd.f32 %v2817_v28, %v670_v56 }
 0x170   : > { %v698_v60 = vmax.f32 %v671_v57, 0.0 }
 0x175   : > { %v672_v58 = vpop.f32.mrf.mxu1 }
 0x176   : > { %v673_v59 = vadd.f32 %v2817_v28, %v672_v58 }
 0x178   : > { %v699_v61 = vmax.f32 %v673_v59, 0.0 }
 0x17a   : > { %v710_v62 = vpack.c.bf16 %v699_v61, %v698_v60 }
 0x17c   : > { %2219 = vmatmul.msk.bf16.gmra.mxu2 %vm616_vm1, %v710_v62 }
 0x17d   : > { %v675_v63 = vpop.f32.mrf.mxu1 }
 0x17e   : > { %v676_v0 = vadd.f32 %v2817_v28, %v675_v63  ;;  %v1754_v63 = vld [vmem:[%s2886_s28 + $0x8] sm:$0xff] }
 0x180   : > { %v700_v3 = vmax.f32 %v676_v0, 0.0  ;;  %v2603_v0 = vmov 0  }
 0x181   : > { %2369 = vset.pattern.permute.xlu0 %v2603_v0  ;;  %2370 = vset.pattern.permute.xlu1 %v2603_v0 }
 0x182   : > { %1773 = vperm.xlu0 %2369, %v1754_v63   ;;  %2368 = vset.pattern.permute.xlu2 %v2603_v0 }
 0x183   : > { %1776 = vperm.xlu1 %2370, %v2897_v9   ;;  %1770 = vperm.xlu2 %2368, %v1753_v13  }
 0x185   : > { %v677_v1 = vpop.f32.mrf.mxu1 }
 0x186   : > { %v678_v2 = vadd.f32 %v2817_v28, %v677_v1 }
 0x188   : > { %v701_v4 = vmax.f32 %v678_v2, 0.0 }
 0x18a   : > { %v711_v5 = vpack.c.bf16 %v701_v4, %v700_v3  ;;  %v2891_v3 = vld [vmem:[%s2886_s28 + $0x40] sm:$0xff] }
 0x18b   : > { %1794 = vperm.xlu0 %2369, %v2891_v3   ;;  %1779 = vperm.xlu2 %2368, %v1756_v19  }
 0x18c   : > { %2220 = vmatmul.msk.bf16.gmra.mxu2 %vm616_vm1, %v711_v5 }
 0x18d   : > { %v680_v7 = vpop.f32.mrf.mxu1 }
 0x18e   : > { %v681_v10 = vadd.f32 %v2817_v28, %v680_v7 }
 0x190   : > { %v702_v14 = vmax.f32 %v681_v10, 0.0  ;;  %v2900_v10 = vld [vmem:[%s2886_s28 + $0x58] sm:$0xff] }
 0x193   : > { %1803 = vperm.xlu0 %2369, %v2900_v10  }
 0x195   : > { %v682_v11 = vpop.f32.mrf.mxu1 }
 0x196   : > { %v683_v12 = vadd.f32 %v2817_v28, %v682_v11 }
 0x198   : > { %v703_v15 = vmax.f32 %v683_v12, 0.0  ;;  %v2317_v12 = vld [vmem:[%s3928_s9 + $0x38] sm:$0xff] }
 0x199   : > { %1056 = vmatpush.bf16.msrb.mxu0 %v2317_v12 }
 0x19a   : > { %v712_v16 = vpack.c.bf16 %v703_v15, %v702_v14  ;;  %v2316_v15 = vld [vmem:[%s3928_s9 + $0x30] sm:$0xff] }
 0x19c   : > { %2221 = vmatmul.msk.bf16.gmra.mxu2 %vm616_vm1, %v712_v16  ;;  %v1758_v16 = vld [vmem:[%s2886_s28 + $0x28] sm:$0xff] }
 0x19d   : > { %v685_v17 = vpop.f32.mrf.mxu1  ;;  %1785 = vperm.xlu1 %2370, %v1758_v16   ;;  %1057 = vmatpush.bf16.msrb.mxu0 %v2316_v15 }
 0x19e   : > { %v686_v20 = vadd.f32 %v2817_v28, %v685_v17  ;;  %v2913_v17 = vld [vmem:[%s2886_s28 + $0x70] sm:$0xff] }
 0x19f   : > { %1812 = vperm.xlu0 %2369, %v2913_v17  }
 0x1a0   : > { %v704_v24 = vmax.f32 %v686_v20, 0.0 }
 0x1a1   : > { %1058 = vmatpush.bf16.msrb.mxu0 %v2315_v18 }
 0x1a5   : > { %v687_v21 = vpop.f32.mrf.mxu1 }
 0x1a6   : > { %v688_v23 = vadd.f32 %v2817_v28, %v687_v21 }
 0x1a8   : > { %v705_v25 = vmax.f32 %v688_v23, 0.0  ;;  %v2314_v23 = vld [vmem:[%s3928_s9 + $0x20] sm:$0xff] }
 0x1a9   : > { %1059 = vmatpush.bf16.msrb.mxu0 %v2314_v23 }
 0x1aa   : > { %v713_v27 = vpack.c.bf16 %v705_v25, %v704_v24  ;;  %v2926_v24 = vld [vmem:[%s2886_s28 + $0x38] sm:$0xff] }
 0x1ab   : > { %1791 = vperm.xlu1 %2370, %v2926_v24  }
 0x1ac   : > { %2222 = vmatmul.msk.bf16.gmra.mxu2 %vm616_vm1, %v713_v27 }
 0x1bf   : > { %v783_v29 = vpop.f32.mrf.mxu2 }
 0x1c0   : > { %v784_v32 = vadd.f32 %v2870_v30, %v783_v29  ;;  %v2604_v29 = vmov 1  }
 0x1c1   : > { %2372 = vset.pattern.permute.xlu0 %v2604_v29 }
 0x1c2   : > { %v823_v34 = vmax.f32 %v784_v32, 0.0  ;;  %v2313_v32 = vld [vmem:[%s3928_s9 + $0x18] sm:$0xff]  ;;  %1837 = vperm.xlu0 %2372, %v1754_v63  }
 0x1c3   : > { %1060 = vmatpush.bf16.msrb.mxu0 %v2313_v32 }
 0x1c7   : > { %v785_v28 = vpop.f32.mrf.mxu2 }
 0x1c8   : > { %v786_v33 = vadd.f32 %v2870_v30, %v785_v28 }
 0x1ca   : > { %v824_v35 = vmax.f32 %v786_v33, 0.0  ;;  %v2312_v33 = vld [vmem:[%s3928_s9 + $0x10] sm:$0xff] }
 0x1cb   : > { %1061 = vmatpush.bf16.msrb.mxu0 %v2312_v33 }
 0x1cc   : > { %v839_v31 = vpack.c.bf16 %v824_v35, %v823_v34  ;;  %v1757_v34 = vld [vmem:[%s2886_s28 + $0x20] sm:$0xff]  ;;  %v1763_v35 = vld [vmem:[%s2886_s28 + $0x50] sm:$0xff] }
 0x1cd   : > { %1782 = vperm.xlu2 %2368, %v1757_v34   ;;  %1800 = vperm.xlu1 %2370, %v1763_v35  }
 0x1ce   : > { %923 = vmatmul.bf16.vlgmr.msrb.gmra.mxu3 %v839_v31  ;;  %v1759_v31 = vld [vmem:[%s2886_s28 + $0x30] sm:$0xff] }
 0x1cf   : > { %v788_v36 = vpop.f32.mrf.mxu2  ;;  %1852 = vperm.xlu0 %2372, %v1759_v31  }
 0x1d0   : > { %v789_v37 = vadd.f32 %v2870_v30, %v788_v36  ;;  %v2311_v36 = vld [vmem:[%s3928_s9 + $0x8] sm:$0xff] }
 0x1d1   : > { %1062 = vmatpush.bf16.msrb.mxu0 %v2311_v36 }
 0x1d2   : > { %v825_v40 = vmax.f32 %v789_v37, 0.0 }
 0x1d5   : > { %1788 = vperm.xlu2 %2368, %v1759_v31  }
 0x1d7   : > { %v790_v38 = vpop.f32.mrf.mxu2 }
 0x1d8   : > { %v791_v39 = vadd.f32 %v2870_v30, %v790_v38 }
 0x1da   : > { %v826_v41 = vmax.f32 %v791_v39, 0.0 }
 0x1dc   : > { %v840_v42 = vpack.c.bf16 %v826_v41, %v825_v40 }
 0x1de   : > { %928 = vmatmul.bf16.gmra.mxu3 %v840_v42  ;;  %v2310_v42 = vld [vmem:[%s3928_s9] sm:$0xff] }
 0x1df   : > { %v793_v43 = vpop.f32.mrf.mxu2  ;;  %1063 = vmatpush.bf16.msrb.mxu0 %v2310_v42 }
 0x1e0   : > { %v794_v44 = vadd.f32 %v2870_v30, %v793_v43 }
 0x1e2   : > { %v827_v47 = vmax.f32 %v794_v44, 0.0  ;;  %v1766_v44 = vld [vmem:[%s2886_s28 + $0x68] sm:$0xff] }
 0x1e3   : > { %1809 = vperm.xlu1 %2370, %v1766_v44  }
 0x1e7   : > { %v795_v45 = vpop.f32.mrf.mxu2 }
 0x1e8   : > { %v796_v46 = vadd.f32 %v2870_v30, %v795_v45  ;;  %v1762_v45 = vld [vmem:[%s2886_s28 + $0x48] sm:$0xff] }
 0x1e9   : > { %1861 = vperm.xlu0 %2372, %v1762_v45   ;;  %1797 = vperm.xlu2 %2368, %v1762_v45  }
 0x1ea   : > { %v828_v48 = vmax.f32 %v796_v46, 0.0  ;;  %v1765_v46 = vld [vmem:[%s2886_s28 + $0x60] sm:$0xff] }
 0x1eb   : > { %2371 = vset.pattern.permute.xlu1 %v2604_v29 }
 0x1ec   : > { %v841_v49 = vpack.c.bf16 %v828_v48, %v827_v47  ;;  %1834 = vperm.xlu1 %2371, %v1753_v13   ;;  %v2953_v48 = vld [vmem:[%s3927_s8] ss:$0 sm:$0xff] }
 0x1ee   : > { %933 = vmatmul.bf16.gmra.mxu3 %v841_v49 }
 0x1ef   : > { %v798_v50 = vpop.f32.mrf.mxu2 }
 0x1f0   : > { %v799_v51 = vadd.f32 %v2870_v30, %v798_v50 }
 0x1f1   : > { %1870 = vperm.xlu0 %2372, %v1765_v46   ;;  %1806 = vperm.xlu2 %2368, %v1765_v46  }
 0x1f2   : > { %v829_v54 = vmax.f32 %v799_v51, 0.0 }
 0x1f4   : > { %1843 = vperm.xlu1 %2371, %v1756_v19  }
 0x1f7   : > { %v800_v52 = vpop.f32.mrf.mxu2 }
 0x1f8   : > { %v801_v53 = vadd.f32 %v2870_v30, %v800_v52 }
 0x1fa   : > { %v830_v55 = vmax.f32 %v801_v53, 0.0 }
 0x1fc   : > { %v842_v56 = vpack.c.bf16 %v830_v55, %v829_v54  ;;  %1849 = vperm.xlu1 %2371, %v1758_v16  }
 0x1fe   : > { %938 = vmatmul.bf16.gmra.mxu3 %v842_v56 }
 0x1ff   : > { %v803_v57 = vpop.f32.mrf.mxu2 }
 0x200   : > { %v804_v58 = vadd.f32 %v2870_v30, %v803_v57 }
 0x202   : > { %v831_v61 = vmax.f32 %v804_v58, 0.0 }
 0x204   : > { %1858 = vperm.xlu1 %2371, %v2891_v3  }
 0x207   : > { %v805_v59 = vpop.f32.mrf.mxu2 }
 0x208   : > { %v806_v60 = vadd.f32 %v2870_v30, %v805_v59 }
 0x20a   : > { %v832_v62 = vmax.f32 %v806_v60, 0.0 }
 0x20c   : > { %v843_v1 = vpack.c.bf16 %v832_v62, %v831_v61  ;;  %1867 = vperm.xlu1 %2371, %v2900_v10  }
 0x20e   : > { %943 = vmatmul.bf16.gmra.mxu3 %v843_v1 }
 0x20f   : > { %v808_v2 = vpop.f32.mrf.mxu2 }
 0x210   : > { %v809_v4 = vadd.f32 %v2870_v30, %v808_v2 }
 0x212   : > { %v833_v7 = vmax.f32 %v809_v4, 0.0  ;;  %v2966_v4 = vpop.permute.xlu2 %1770 }
 0x214   : > { %1876 = vperm.xlu1 %2371, %v2913_v17   ;;  %v2978_v17 = vpop.permute.xlu1 %1776 }
 0x217   : > { %v810_v5 = vpop.f32.mrf.mxu2 }
 0x218   : > { %v811_v6 = vadd.f32 %v2870_v30, %v810_v5 }
 0x21a   : > { %v834_v8 = vmax.f32 %v811_v6, 0.0 }
 0x21c   : > { %v844_v11 = vpack.c.bf16 %v834_v8, %v833_v7  ;;  %v2968_v7 = vpop.permute.xlu0 %1773  ;;  %v2970_v8 = vpop.permute.xlu2 %1779 }
 0x21e   : > { %948 = vmatmul.bf16.gmra.mxu3 %v844_v11 }
 0x21f   : > { %v813_v14 = vpop.f32.mrf.mxu2 }
 0x220   : > { %v814_v20 = vadd.f32 %v2870_v30, %v813_v14 }
 0x222   : > { %v835_v25 = vmax.f32 %v814_v20, 0.0 }
 0x224   : > { %v2974_v12 = vpop.permute.xlu0 %1794 }
 0x227   : > { %v815_v21 = vpop.f32.mrf.mxu2  ;;  %v2976_v16 = vpop.permute.xlu2 %1782 }
 0x228   : > { %v816_v22 = vadd.f32 %v2870_v30, %v815_v21 }
 0x22a   : > { %v836_v26 = vmax.f32 %v816_v22, 0.0  ;;  %v2983_v22 = vpop.permute.xlu1 %1785 }
 0x22c   : > { %v845_v27 = vpack.c.bf16 %v836_v26, %v835_v25  ;;  %v2980_v19 = vpop.permute.xlu0 %1803 }
 0x22e   : > { %953 = vmatmul.bf16.gmra.mxu3 %v845_v27 }
 0x22f   : > { %v818_v28 = vpop.f32.mrf.mxu2  ;;  %v1789_v20 = vpop.permute.xlu2 %1788 }
 0x230   : > { %v819_v37 = vadd.f32 %v2870_v30, %v818_v28 }
 0x232   : > { %v837_v40 = vmax.f32 %v819_v37, 0.0  ;;  %v2988_v28 = vpop.permute.xlu1 %1791 }
 0x237   : > { %v820_v38 = vpop.f32.mrf.mxu2 }
 0x238   : > { %v821_v39 = vadd.f32 %v2870_v30, %v820_v38  ;;  %v1768_v30 = vld [vmem:[%s2886_s28 + $0x78] sm:$0xff]  ;;  %s2073_s28 = sshll.u32 %s3757_s19, 4  ;;  %s2074_s28 = int_to_ptr.vmem [resolvable:$true] %s2073_s28 }
 0x239   : > { %1879 = vperm.xlu0 %2372, %v1768_v30   ;;  %1815 = vperm.xlu2 %2368, %v1768_v30  }
 0x23a   : > { %v838_v41 = vmax.f32 %v821_v39, 0.0 }
 0x23c   : > { %v846_v43 = vpack.c.bf16 %v838_v41, %v837_v40 }
 0x23e   : > { %958 = vmatmul.bf16.gmra.mxu3 %v846_v43 }
 0x23f   : > { %v2991_v31 = vpop.permute.xlu1 %1800 }
 0x241   : > { %2373 = vset.pattern.permute.xlu2 %v2604_v29  ;;  %v2986_v29 = vpop.permute.xlu0 %1812 }
 0x242   : > { %1840 = vperm.xlu2 %2373, %v2897_v9  }
 0x243   : > { %v1798_v32 = vpop.permute.xlu2 %1797 }
 0x249   : > { %v2993_v37 = vpop.permute.xlu0 %1837 }
 0x24a   : > { %1846 = vperm.xlu2 %2373, %v1757_v34  }
 0x24b   : > { %v1807_v34 = vpop.permute.xlu2 %1806 }
 0x251   : > { %v924_v47 = vpop.f32.mrf.mxu3  ;;  %v1853_v45 = vpop.permute.xlu0 %1852 }
 0x252   : > { %v925_v49 = vadd.f32 %v2953_v48, %v924_v47  ;;  %1855 = vperm.xlu2 %2373, %v2926_v24  }
 0x254   : > { %v964_v52 = vmax.f32 %v925_v49, 0.0 }
 0x255   : > { %v2998_v43 = vpop.permute.xlu1 %1809 }
 0x256   : > { %3959 = vst [vmem:[#allocation6_spill] sm:$0xff] %v2998_v43 }
 0x259   : > { %v926_v50 = vpop.f32.mrf.mxu3 }
 0x25a   : > { %v927_v51 = vadd.f32 %v2953_v48, %v926_v50  ;;  %1864 = vperm.xlu2 %2373, %v1763_v35  }
 0x25c   : > { %v965_v53 = vmax.f32 %v927_v51, 0.0 }
 0x25e   : > { %v980_v54 = vpack.c.bf16 %v965_v53, %v964_v52  ;;  %v1835_v50 = vpop.permute.xlu1 %1834  ;;  %v1105_v53 = vlaneseq }
 0x260   : > { %1064 = vmatmul.bf16.vlgmr.msrb.gmra.mxu0 %v980_v54  ;;  %v1862_v54 = vpop.permute.xlu0 %1861 }
 0x261   : > { %v929_v55 = vpop.f32.mrf.mxu3 }
 0x262   : > { %v930_v56 = vadd.f32 %v2953_v48, %v929_v55  ;;  %1873 = vperm.xlu2 %2373, %v1766_v44  }
 0x264   : > { %v966_v59 = vmax.f32 %v930_v56, 0.0  ;;  %v3002_v56 = vand.u32 127, %v1105_v53 }
 0x266   : > { %vm1817_vm2 = vcmp.eq.s32.totalorder %v3002_v56, %v2966_v4  ;;  %vm1881_vm3 = vcmp.eq.s32.totalorder %v3002_v56, %v1835_v50  ;;  %vm1820_vm4 = vcmp.eq.s32.totalorder %v3002_v56, %v2970_v8  ;;  %vm1821_vm6 = vcmp.eq.s32.totalorder %v3002_v56, %v2976_v16 }
 0x267   : > { %vm1823_vm8 = vcmp.eq.s32.totalorder %v3002_v56, %v1789_v20  ;;  %vm1887_vm9 = vcmp.eq.s32.totalorder %v3002_v56, %v1853_v45  ;;  %vm3015_vm10 = vmor %vm1817_vm2, %vm1881_vm3  ;;  %vm1826_vm11 = vcmp.eq.s32.totalorder %v3002_v56, %v1798_v32  ;;  %vm1890_vm12 = vcmp.eq.s32.totalorder %v3002_v56, %v1862_v54 }
 0x268   : > { %vm1829_vm14 = vcmp.eq.s32.totalorder %v3002_v56, %v1807_v34  ;;  %vm3032_vm1 = vmor %vm1823_vm8, %vm1887_vm9  ;;  %v3968_v4 = vmov 0  ;;  %vm1822_vm8 = vcmp.eq.s32.totalorder %v3002_v56, %v2983_v22  ;;  %v3979_v22 = vmov 0 }
 0x269   : > { %v931_v57 = vpop.f32.mrf.mxu3  ;;  %vm3037_vm2 = vmor %vm1826_vm11, %vm1890_vm12  ;;  %vm1824_vm12 = vcmp.eq.s32.totalorder %v3002_v56, %v2988_v28 }
 0x26a   : > { %v932_v58 = vadd.f32 %v2953_v48, %v931_v57  ;;  %v3969_v4 = vsel %vm3037_vm2, 4294967295, %v3968_v4 }
 0x26c   : > { %v967_v60 = vmax.f32 %v932_v58, 0.0 }
 0x26e   : > { %v981_v61 = vpack.c.bf16 %v967_v60, %v966_v59  ;;  %v1844_v59 = vpop.permute.xlu1 %1843 }
 0x26f   : > { %vm1884_vm5 = vcmp.eq.s32.totalorder %v3002_v56, %v1844_v59 }
 0x270   : > { %1069 = vmatmul.bf16.gmra.mxu0 %v981_v61  ;;  %v1871_v61 = vpop.permute.xlu0 %1870  ;;  %vm3021_vm13 = vmor %vm1820_vm4, %vm1884_vm5  ;;  %vm3932_vm4 = vcmp.lt.s32.totalorder %v3002_v56, 8  ;;  %vm1191_vm5 = vcmp.ge.s32.totalorder %v3002_v56, 5 }
 0x271   : > { %v934_v62 = vpop.f32.mrf.mxu3  ;;  %vm1893_vm15 = vcmp.eq.s32.totalorder %v3002_v56, %v1871_v61  ;;  %vm3059_vm9 = vmand %vm1191_vm5, %vm3932_vm4  ;;  %vm1827_vm5 = vcmp.eq.s32.totalorder %v3002_v56, %v2991_v31 }
 0x272   : > { %v935_v63 = vadd.f32 %v2953_v48, %v934_v62  ;;  %vm3041_vm3 = vmor %vm1829_vm14, %vm1893_vm15  ;;  %vm3933_vm14 = vcmp.lt.s32.totalorder %v3002_v56, 5 }
 0x274   : > { %v968_v2 = vmax.f32 %v935_v63, 0.0 }
 0x279   : > { %v936_v0 = vpop.f32.mrf.mxu3 }
 0x27a   : > { %v937_v1 = vadd.f32 %v2953_v48, %v936_v0 }
 0x27c   : > { %v969_v3 = vmax.f32 %v937_v1, 0.0 }
 0x27e   : > { %v982_v5 = vpack.c.bf16 %v969_v3, %v968_v2  ;;  %v3966_v2 = vmov 0 }
 0x27f   : > { %v3967_v2 = vsel %vm3032_vm1, 4294967295, %v3966_v2 }
 0x280   : > { %1074 = vmatmul.bf16.gmra.mxu0 %v982_v5  ;;  %v3970_v5 = vmov 0 }
 0x281   : > { %v939_v6 = vpop.f32.mrf.mxu3  ;;  %v3971_v5 = vsel %vm3041_vm3, 4294967295, %v3970_v5 }
 0x282   : > { %v940_v9 = vadd.f32 %v2953_v48, %v939_v6 }
 0x284   : > { %v970_v13 = vmax.f32 %v940_v9, 0.0 }
 0x289   : > { %v941_v10 = vpop.f32.mrf.mxu3 }
 0x28a   : > { %v942_v11 = vadd.f32 %v2953_v48, %v941_v10 }
 0x28c   : > { %v971_v14 = vmax.f32 %v942_v11, 0.0  ;;  %v1850_v11 = vpop.permute.xlu1 %1849 }
 0x28d   : > { %vm1886_vm11 = vcmp.eq.s32.totalorder %v3002_v56, %v1850_v11 }
 0x28e   : > { %v983_v15 = vpack.c.bf16 %v971_v14, %v970_v13  ;;  %vm3078_vm2 = vmor %vm1822_vm8, %vm1886_vm11  ;;  %vm1882_vm8 = vcmp.eq.s32.totalorder %v3002_v56, %v2993_v37  ;;  %vm1825_vm11 = vcmp.eq.s32.totalorder %v3002_v56, %v2974_v12 }
 0x290   : > { %1079 = vmatmul.bf16.gmra.mxu0 %v983_v15 }
 0x291   : > { %v944_v18 = vpop.f32.mrf.mxu3 }
 0x292   : > { %v945_v21 = vadd.f32 %v2953_v48, %v944_v18 }
 0x293   : > { %v2996_v42 = vpop.permute.xlu2 %1815 }
 0x294   : > { %v972_v25 = vmax.f32 %v945_v21, 0.0  ;;  %3958 = vst [vmem:[#allocation5_spill] sm:$0xff] %v2996_v42 }
 0x299   : > { %v946_v23 = vpop.f32.mrf.mxu3 }
 0x29a   : > { %v947_v24 = vadd.f32 %v2953_v48, %v946_v23  ;;  %v3981_v23 = vmov 0 }
 0x29c   : > { %v973_v26 = vmax.f32 %v947_v24, 0.0  ;;  %v1841_v30 = vpop.permute.xlu2 %1840  ;;  %v1859_v24 = vpop.permute.xlu1 %1858 }
 0x29e   : > { %v984_v27 = vpack.c.bf16 %v973_v26, %v972_v25 }
 0x2a0   : > { %1084 = vmatmul.bf16.gmra.mxu0 %v984_v27 }
 0x2a1   : > { %v949_v33 = vpop.f32.mrf.mxu3 }
 0x2a2   : > { %v950_v35 = vadd.f32 %v2953_v48, %v949_v33 }
 0x2a4   : > { %v974_v39 = vmax.f32 %v950_v35, 0.0  ;;  %v1847_v58 = vpop.permute.xlu2 %1846  ;;  %v1868_v28 = vpop.permute.xlu1 %1867 }
 0x2a5   : > { %vm1885_vm7 = vcmp.eq.s32.totalorder %v3002_v56, %v1847_v58 }
 0x2a6   : > { %vm3028_vm0 = vmor %vm1821_vm6, %vm1885_vm7  ;;  %vm1819_vm6 = vcmp.eq.s32.totalorder %v3002_v56, %v2978_v17  ;;  %vm1883_vm7 = vcmp.eq.s32.totalorder %v3002_v56, %v1841_v30 }
 0x2a7   : > { %vm3068_vm3 = vmor %vm1819_vm6, %vm1883_vm7 }
 0x2a9   : > { %v951_v36 = vpop.f32.mrf.mxu3 }
 0x2aa   : > { %v952_v38 = vadd.f32 %v2953_v48, %v951_v36 }
 0x2ac   : > { %v975_v40 = vmax.f32 %v952_v38, 0.0  ;;  %v1856_v10 = vpop.permute.xlu2 %1855 }
 0x2ad   : > { %vm1888_vm15 = vcmp.eq.s32.totalorder %v3002_v56, %v1856_v10 }
 0x2ae   : > { %v985_v41 = vpack.c.bf16 %v975_v40, %v974_v39  ;;  %vm3088_vm6 = vmor %vm1824_vm12, %vm1888_vm15  ;;  %vm1889_vm12 = vcmp.eq.s32.totalorder %v3002_v56, %v1859_v24  ;;  %vm1828_vm15 = vcmp.eq.s32.totalorder %v3002_v56, %v2980_v19 }
 0x2af   : > { %v3980_v22 = vsel %vm3088_vm6, 4294967295, %v3979_v22  ;;  %vm3989_vm6 = vcmp.lt.s32.totalorder %v3002_v56, 5 }
 0x2b0   : > { %1089 = vmatmul.bf16.gmra.mxu0 %v985_v41 }
 0x2b1   : > { %v954_v44 = vpop.f32.mrf.mxu3 }
 0x2b2   : > { %v955_v46 = vadd.f32 %v2953_v48, %v954_v44 }
 0x2b4   : > { %v976_v51 = vmax.f32 %v955_v46, 0.0  ;;  %v1865_v15 = vpop.permute.xlu2 %1864 }
 0x2b5   : > { %vm1891_vm4 = vcmp.eq.s32.totalorder %v3002_v56, %v1865_v15 }
 0x2b6   : > { %vm3092_vm7 = vmor %vm1827_vm5, %vm1891_vm4  ;;  %vm1818_vm4 = vcmp.eq.s32.totalorder %v3002_v56, %v2968_v7  ;;  %vm1892_vm5 = vcmp.eq.s32.totalorder %v3002_v56, %v1868_v28 }
 0x2b7   : > { %v3982_v23 = vsel %vm3092_vm7, 4294967295, %v3981_v23  ;;  %vm3122_vm7 = vmor %vm1825_vm11, %vm1889_vm12 }
 0x2b8   : > { %vm3132_vm1 = vmor %vm1828_vm15, %vm1892_vm5 }
 0x2b9   : > { %v956_v47 = vpop.f32.mrf.mxu3 }
 0x2ba   : > { %v957_v49 = vadd.f32 %v2953_v48, %v956_v47 }
 0x2bc   : > { %v977_v52 = vmax.f32 %v957_v49, 0.0 }
 0x2be   : > { %v986_v55 = vpack.c.bf16 %v977_v52, %v976_v51 }
 0x2c0   : > { %1094 = vmatmul.bf16.gmra.mxu0 %v986_v55 }
 0x2c1   : > { %v959_v57 = vpop.f32.mrf.mxu3 }
 0x2c2   : > { %v960_v63 = vadd.f32 %v2953_v48, %v959_v57 }
 0x2c4   : > { %v978_v6 = vmax.f32 %v960_v63, 0.0 }
 0x2c9   : > { %v961_v1 = vpop.f32.mrf.mxu3 }
 0x2ca   : > { %v962_v3 = vadd.f32 %v2953_v48, %v961_v1  ;;  %v3053_v48 = vld [vmem:[%s3929_s10] ss:$0 sm:$0xff] }
 0x2cc   : > { %v979_v8 = vmax.f32 %v962_v3, 0.0 }
 0x2ce   : > { %v987_v9 = vpack.c.bf16 %v979_v8, %v978_v6 }
 0x2d0   : > { %1099 = vmatmul.bf16.gmra.mxu0 %v987_v9 }
 0x2dd   : > { %v1065_v14 = vpop.f32.mrf.mxu0 }
 0x2de   : > { %v3075_v17 = vadd.f32 %v3053_v48, %v1065_v14 }
 0x2e0   : > { %3976 = vst [vmem:[#allocation7_spill] sm:$0xff] %v3075_v17  ;;  %v1193_v20 = vsel %vm3059_vm9, %v3075_v17, -1e+30  ;;  %v1111_v21 = vsel %vm3933_vm14, %v3075_v17, -1e+30 }
 0x2e1   : > { %1209 = vmax.xlane.f32.xlu1 %v1193_v20  ;;  %1127 = vmax.xlane.f32.xlu0 %v1111_v21 }
 0x2e5   : > { %v1067_v25 = vpop.f32.mrf.mxu0 }
 0x2e6   : > { %v3097_v26 = vadd.f32 %v3053_v48, %v1067_v25 }
 0x2e8   : > { %3983 = vst [vmem:[#allocation8_spill] sm:$0xff] %v3097_v26  ;;  %v1194_v27 = vsel %vm3059_vm9, %v3097_v26, -1e+30  ;;  %v1112_v32 = vsel %vm3933_vm14, %v3097_v26, -1e+30  ;;  %vm3115_vm14 = vmor %vm1818_vm4, %vm1882_vm8 }
 0x2e9   : > { %1211 = vmax.xlane.f32.xlu2 %v1194_v27  ;;  %1129 = vmax.xlane.f32.xlu0 %v1112_v32  ;;  %vm3993_vm4 = vmmov %vm3989_vm6 }
 0x2ea   : > { %vm3998_vm8 = vmmov %vm3993_vm4 }
 0x2eb   : > { %vm3999_vm11 = vmmov %vm3993_vm4 }
 0x2ec   : > { %vm4001_vm12 = vmmov %vm3993_vm4 }
 0x2ed   : > { %v1070_v33 = vpop.f32.mrf.mxu0  ;;  %vm4003_vm15 = vmmov %vm3993_vm4 }
 0x2ee   : > { %v3120_v7 = vadd.f32 %v3053_v48, %v1070_v33  ;;  %vm4005_vm5 = vmmov %vm3993_vm4 }
 0x2f0   : > { %3986 = vst [vmem:[#allocation9_spill] sm:$0xff] %v3120_v7  ;;  %v1113_v12 = vsel %vm3989_vm6, %v3120_v7, -1e+30  ;;  %v1195_v19 = vsel %vm3059_vm9, %v3120_v7, -1e+30  ;;  %vm3995_vm6 = vmmov %vm3993_vm4 }
 0x2f1   : > { %1131 = vmax.xlane.f32.xlu1 %v1113_v12  ;;  %1213 = vmax.xlane.f32.xlu0 %v1195_v19 }
 0x2f5   : > { %v1072_v36 = vpop.f32.mrf.mxu0 }
 0x2f6   : > { %v3137_v37 = vadd.f32 %v3053_v48, %v1072_v36 }
 0x2f8   : > { %3992 = vst [vmem:[#allocation10_spill] sm:$0xff] %v3137_v37  ;;  %v1114_v38 = vsel %vm3993_vm4, %v3137_v37, -1e+30  ;;  %v1196_v44 = vsel %vm3059_vm9, %v3137_v37, -1e+30 }
 0x2f9   : > { %1133 = vmax.xlane.f32.xlu1 %v1114_v38 }
 0x2fd   : > { %v1075_v39 = vpop.f32.mrf.mxu0 }
 0x2fe   : > { %v3143_v40 = vadd.f32 %v3053_v48, %v1075_v39  ;;  %v3235_v39 = vpop.permute.xlu0 %1879 }
 0x2ff   : > { %4013 = vst [vmem:[#allocation21_spill] sm:$0xff] %v3235_v39 }
 0x300   : > { %3994 = vst [vmem:[#allocation11_spill] sm:$0xff] %v3143_v40  ;;  %v1115_v41 = vsel %vm3995_vm6, %v3143_v40, -1e+30  ;;  %v1197_v30 = vsel %vm3059_vm9, %v3143_v40, -1e+30  ;;  %vm4008_vm6 = vmmov %vm3993_vm4 }
 0x301   : > { %1135 = vmax.xlane.f32.xlu2 %v1115_v41  ;;  %1215 = vmax.xlane.f32.xlu1 %v1196_v44  ;;  %v3237_v41 = vpop.permute.xlu1 %1876 }
 0x305   : > { %v1077_v45 = vpop.f32.mrf.mxu0 }
 0x306   : > { %v3152_v46 = vadd.f32 %v3053_v48, %v1077_v45 }
 0x308   : > { %3996 = vst [vmem:[#allocation12_spill] sm:$0xff] %v3152_v46  ;;  %v1198_v47 = vsel %vm3059_vm9, %v3152_v46, -1e+30  ;;  %v1116_v51 = vsel %vm3998_vm8, %v3152_v46, -1e+30  ;;  %vm4010_vm8 = vmmov %vm3993_vm4 }
 0x309   : > { %1217 = vmax.xlane.f32.xlu2 %v1197_v30  ;;  %1219 = vmax.xlane.f32.xlu0 %v1198_v47 }
 0x30d   : > { %v1080_v49 = vpop.f32.mrf.mxu0 }
 0x30e   : > { %v3161_v50 = vadd.f32 %v3053_v48, %v1080_v49  ;;  %v3248_v49 = vpop.permute.xlu2 %1873 }
 0x30f   : > { %4016 = vst [vmem:[#allocation23_spill] sm:$0xff] %v3248_v49 }
 0x310   : > { %3997 = vst [vmem:[#allocation13_spill] sm:$0xff] %v3161_v50  ;;  %v1199_v52 = vsel %vm3059_vm9, %v3161_v50, -1e+30  ;;  %v1117_v53 = vsel %vm3999_vm11, %v3161_v50, -1e+30  ;;  %vm4012_vm11 = vmmov %vm3993_vm4 }
 0x311   : > { %1137 = vmax.xlane.f32.xlu2 %v1116_v51  ;;  %1221 = vmax.xlane.f32.xlu1 %v1199_v52 }
 0x312   : > { %1139 = vmax.xlane.f32.xlu0 %v1117_v53 }
 0x315   : > { %v1082_v54 = vpop.f32.mrf.mxu0 }
 0x316   : > { %v3173_v55 = vadd.f32 %v3053_v48, %v1082_v54 }
 0x318   : > { %4000 = vst [vmem:[#allocation14_spill] sm:$0xff] %v3173_v55  ;;  %v1200_v57 = vsel %vm3059_vm9, %v3173_v55, -1e+30  ;;  %v1118_v58 = vsel %vm4001_vm12, %v3173_v55, -1e+30  ;;  %vm4015_vm12 = vmmov %vm3993_vm4 }
 0x319   : > { %1223 = vmax.xlane.f32.xlu2 %v1200_v57  ;;  %1141 = vmax.xlane.f32.xlu1 %v1118_v58 }
 0x31d   : > { %v1085_v59 = vpop.f32.mrf.mxu0 }
 0x31e   : > { %v3182_v61 = vadd.f32 %v3053_v48, %v1085_v59 }
 0x320   : > { %4002 = vst [vmem:[#allocation15_spill] sm:$0xff] %v3182_v61  ;;  %v1119_v63 = vsel %vm4003_vm15, %v3182_v61, -1e+30  ;;  %v1201_v1 = vsel %vm3059_vm9, %v3182_v61, -1e+30  ;;  %vm4017_vm15 = vmmov %vm3993_vm4 }
 0x321   : > { %1143 = vmax.xlane.f32.xlu2 %v1119_v63  ;;  %1225 = vmax.xlane.f32.xlu0 %v1201_v1 }
 0x325   : > { %v1087_v3 = vpop.f32.mrf.mxu0 }
 0x326   : > { %v3191_v6 = vadd.f32 %v3053_v48, %v1087_v3 }
 0x328   : > { %4004 = vst [vmem:[#allocation16_spill] sm:$0xff] %v3191_v6  ;;  %v1202_v8 = vsel %vm3059_vm9, %v3191_v6, -1e+30  ;;  %v1120_v9 = vsel %vm4005_vm5, %v3191_v6, -1e+30  ;;  %vm4019_vm5 = vmmov %vm3993_vm4 }
 0x329   : > { %1227 = vmax.xlane.f32.xlu1 %v1202_v8  ;;  %1145 = vmax.xlane.f32.xlu0 %v1120_v9 }
 0x32d   : > { %v1090_v10 = vpop.f32.mrf.mxu0 }
 0x32e   : > { %v3200_v11 = vadd.f32 %v3053_v48, %v1090_v10 }
 0x330   : > { %4006 = vst [vmem:[#allocation17_spill] sm:$0xff] %v3200_v11  ;;  %v1203_v14 = vsel %vm3059_vm9, %v3200_v11, -1e+30  ;;  %v1121_v15 = vsel %vm3993_vm4, %v3200_v11, -1e+30 }
 0x331   : > { %1229 = vmax.xlane.f32.xlu2 %v1203_v14  ;;  %1147 = vmax.xlane.f32.xlu1 %v1121_v15 }
 0x335   : > { %v1092_v20 = vpop.f32.mrf.mxu0 }
 0x336   : > { %v3209_v21 = vadd.f32 %v3053_v48, %v1092_v20 }
 0x338   : > { %4007 = vst [vmem:[#allocation18_spill] sm:$0xff] %v3209_v21  ;;  %v1122_v24 = vsel %vm4008_vm6, %v3209_v21, -1e+30  ;;  %v1204_v25 = vsel %vm3059_vm9, %v3209_v21, -1e+30  ;;  %vm4020_vm6 = vcmp.lt.s32.totalorder %v3002_v56, 8 }
 0x339   : > { %1149 = vmax.xlane.f32.xlu2 %v1122_v24  ;;  %1231 = vmax.xlane.f32.xlu0 %v1204_v25 }
 0x33d   : > { %v1095_v27 = vpop.f32.mrf.mxu0 }
 0x33e   : > { %v3218_v32 = vadd.f32 %v3053_v48, %v1095_v27 }
 0x340   : > { %4009 = vst [vmem:[#allocation19_spill] sm:$0xff] %v3218_v32  ;;  %v1205_v28 = vsel %vm3059_vm9, %v3218_v32, -1e+30  ;;  %v1123_v33 = vsel %vm4010_vm8, %v3218_v32, -1e+30  ;;  %vm4021_vm8 = vmmov %vm3993_vm4 }
 0x341   : > { %1233 = vmax.xlane.f32.xlu1 %v1205_v28  ;;  %1151 = vmax.xlane.f32.xlu0 %v1123_v33 }
 0x345   : > { %v1097_v12 = vpop.f32.mrf.mxu0 }
 0x346   : > { %v3227_v19 = vadd.f32 %v3053_v48, %v1097_v12 }
 0x348   : > { %4011 = vst [vmem:[#allocation20_spill] sm:$0xff] %v3227_v19  ;;  %v1206_v36 = vsel %vm3059_vm9, %v3227_v19, -1e+30  ;;  %v1124_v38 = vsel %vm4012_vm11, %v3227_v19, -1e+30  ;;  %vm4022_vm11 = vmmov %vm3993_vm4 }
 0x349   : > { %1235 = vmax.xlane.f32.xlu2 %v1206_v36  ;;  %1153 = vmax.xlane.f32.xlu1 %v1124_v38 }
 0x34d   : > { %v1100_v44 = vpop.f32.mrf.mxu0 }
 0x34e   : > { %v3240_v45 = vadd.f32 %v3053_v48, %v1100_v44 }
 0x350   : > { %4014 = vst [vmem:[#allocation22_spill] sm:$0xff] %v3240_v45  ;;  %v1125_v30 = vsel %vm4015_vm12, %v3240_v45, -1e+30  ;;  %v1207_v47 = vsel %vm3059_vm9, %v3240_v45, -1e+30  ;;  %vm4023_vm12 = vmmov %vm4020_vm6 }
 0x351   : > { %1155 = vmax.xlane.f32.xlu2 %v1125_v30  ;;  %1237 = vmax.xlane.f32.xlu0 %v1207_v47 }
 0x354   : > { %v1210_v51 = vpop.xlane.xlu1 %1209  ;;  %v1128_v52 = vpop.xlane.xlu0 %1127 }
 0x355   : > { %v1241_v53 = vsel %vm3059_vm9, %v1210_v51, 0.0  ;;  %v1159_v54 = vsel %vm4017_vm15, %v1128_v52, 0.0  ;;  %v1102_v57 = vpop.f32.mrf.mxu0  ;;  %vm4024_vm15 = vmmov %vm3993_vm4 }
 0x356   : > { %v1257_v58 = vadd.f32 %v1241_v53, %v1159_v54  ;;  %v3255_v59 = vadd.f32 %v3053_v48, %v1102_v57 }
 0x358   : > { %4018 = vst [vmem:[#allocation24_spill] sm:$0xff] %v3255_v59  ;;  %v3258_v63 = vsub.f32 %v3075_v17, %v1257_v58  ;;  %v1208_v1 = vsel %vm3059_vm9, %v3255_v59, -1e+30  ;;  %v1126_v3 = vsel %vm4019_vm5, %v3255_v59, -1e+30  ;;  %vm4025_vm5 = vmmov %vm4020_vm6 }
 0x359   : > { %1239 = vmax.xlane.f32.xlu1 %v1208_v1  ;;  %1157 = vmax.xlane.f32.xlu0 %v1126_v3 }
 0x35a   : > { %v1289_v8 = vmul.f32 1.442695, %v3258_v63 }
 0x35c   : > { %2379 = vpow2.f32 %v1289_v8  ;;  %v1212_v9 = vpop.xlane.xlu2 %1211  ;;  %v1130_v10 = vpop.xlane.xlu0 %1129 }
 0x35d   : > { %v1242_v48 = vsel %vm3059_vm9, %v1212_v9, 0.0  ;;  %v1160_v14 = vsel %vm3993_vm4, %v1130_v10, 0.0 }
 0x35e   : > { %v1258_v15 = vadd.f32 %v1242_v48, %v1160_v14 }
 0x360   : > { %v3272_v20 = vsub.f32 %v3097_v26, %v1258_v15 }
 0x362   : > { %v2380_v24 = vpop.eup %2379  ;;  %v1291_v25 = vmul.f32 1.442695, %v3272_v20 }
 0x363   : > { %v3277_v27 = vsel %vm4020_vm6, %v2380_v24, 0.0  ;;  %vm4026_vm6 = vmmov %vm3993_vm4 }
 0x364   : > { %2381 = vpow2.f32 %v1291_v25  ;;  %v1132_v28 = vpop.xlane.xlu1 %1131  ;;  %v1214_v33 = vpop.xlane.xlu0 %1213  ;;  %v1497_v12 = vsel %vm3059_vm9, %v3277_v27, 0.0  ;;  %v1337_v36 = vsel %vm4021_vm8, %v3277_v27, 0.0  ;;  %vm4027_vm8 = vmmov %vm3993_vm4 }
 0x365   : > { %v1161_v38 = vsel %vm4022_vm11, %v1132_v28, 0.0  ;;  %v1243_v44 = vsel %vm3059_vm9, %v1214_v33, 0.0  ;;  %1513 = vadd.xlane.f32.xlu0 %v1497_v12  ;;  %1353 = vadd.xlane.f32.xlu2 %v1337_v36  ;;  %vm4028_vm11 = vmmov %vm4025_vm5 }
 0x366   : > { %v1259_v30 = vadd.f32 %v1243_v44, %v1161_v38 }
 0x368   : > { %v3290_v47 = vsub.f32 %v3120_v7, %v1259_v30 }
 0x36a   : > { %v2382_v51 = vpop.eup %2381  ;;  %v1293_v52 = vmul.f32 1.442695, %v3290_v47 }
 0x36b   : > { %v3295_v53 = vsel %vm4023_vm12, %v2382_v51, 0.0  ;;  %vm4029_vm12 = vmmov %vm3993_vm4 }
 0x36c   : > { %2383 = vpow2.f32 %v1293_v52  ;;  %v1134_v54 = vpop.xlane.xlu1 %1133  ;;  %v1498_v57 = vsel %vm3059_vm9, %v3295_v53, 0.0  ;;  %v1338_v58 = vsel %vm4024_vm15, %v3295_v53, 0.0  ;;  %vm4030_vm15 = vmmov %vm3993_vm4 }
 0x36d   : > { %1515 = vadd.xlane.f32.xlu1 %v1498_v57  ;;  %1355 = vadd.xlane.f32.xlu0 %v1338_v58  ;;  %v1162_v14 = vsel %vm4026_vm6, %v1134_v54, 0.0 }
 0x372   : > { %v2384_v1 = vpop.eup %2383 }
 0x373   : > { %v3305_v3 = vsel %vm4025_vm5, %v2384_v1, 0.0  ;;  %vm4031_vm5 = vmmov %vm3993_vm4 }
 0x374   : > { %v1136_v8 = vpop.xlane.xlu2 %1135  ;;  %v1216_v9 = vpop.xlane.xlu1 %1215  ;;  %v1499_v10 = vsel %vm3059_vm9, %v3305_v3, 0.0  ;;  %v1339_v48 = vsel %vm3993_vm4, %v3305_v3, 0.0  ;;  %vm4032_vm4 = vmmov %vm4028_vm11 }
 0x375   : > { %v1244_v15 = vsel %vm3059_vm9, %v1216_v9, 0.0  ;;  %1517 = vadd.xlane.f32.xlu2 %v1499_v10  ;;  %1357 = vadd.xlane.f32.xlu1 %v1339_v48  ;;  %v1163_v36 = vsel %vm4027_vm8, %v1136_v8, 0.0  ;;  %vm4033_vm6 = vmmov %vm4031_vm5 }
 0x376   : > { %v1260_v24 = vadd.f32 %v1244_v15, %v1162_v14  ;;  %vm4034_vm8 = vmmov %vm4031_vm5 }
 0x378   : > { %v3318_v25 = vsub.f32 %v3137_v37, %v1260_v24 }
 0x37a   : > { %v1295_v28 = vmul.f32 1.442695, %v3318_v25 }
 0x37c   : > { %2385 = vpow2.f32 %v1295_v28  ;;  %v1218_v33 = vpop.xlane.xlu2 %1217  ;;  %v1220_v12 = vpop.xlane.xlu0 %1219 }
 0x37d   : > { %v1245_v38 = vsel %vm3059_vm9, %v1218_v33, 0.0  ;;  %v1246_v9 = vsel %vm3059_vm9, %v1220_v12, 0.0 }
 0x37e   : > { %v1261_v44 = vadd.f32 %v1245_v38, %v1163_v36 }
 0x380   : > { %v3326_v30 = vsub.f32 %v3143_v40, %v1261_v44 }
 0x382   : > { %v2386_v51 = vpop.eup %2385  ;;  %v1297_v52 = vmul.f32 1.442695, %v3326_v30 }
 0x383   : > { %v3331_v54 = vsel %vm4028_vm11, %v2386_v51, 0.0  ;;  %vm4035_vm11 = vmmov %vm4032_vm4 }
 0x384   : > { %2387 = vpow2.f32 %v1297_v52  ;;  %v1138_v57 = vpop.xlane.xlu2 %1137  ;;  %v1222_v58 = vpop.xlane.xlu1 %1221  ;;  %v1500_v1 = vsel %vm3059_vm9, %v3331_v54, 0.0  ;;  %v1340_v8 = vsel %vm4029_vm12, %v3331_v54, 0.0  ;;  %vm4036_vm12 = vmmov %vm4031_vm5 }
 0x385   : > { %v1164_v10 = vsel %vm4030_vm15, %v1138_v57, 0.0  ;;  %v1247_v48 = vsel %vm3059_vm9, %v1222_v58, 0.0  ;;  %v1140_v14 = vpop.xlane.xlu0 %1139  ;;  %1519 = vadd.xlane.f32.xlu0 %v1500_v1  ;;  %1359 = vadd.xlane.f32.xlu2 %v1340_v8  ;;  %vm4037_vm15 = vmmov %vm4032_vm4 }
 0x386   : > { %v1262_v15 = vadd.f32 %v1246_v9, %v1164_v10  ;;  %v1165_v24 = vsel %vm4031_vm5, %v1140_v14, 0.0 }
 0x387   : > { %v1263_v28 = vadd.f32 %v1247_v48, %v1165_v24 }
 0x388   : > { %v3348_v33 = vsub.f32 %v3152_v46, %v1262_v15 }
 0x389   : > { %v3351_v36 = vsub.f32 %v3161_v50, %v1263_v28 }
 0x38a   : > { %v2388_v12 = vpop.eup %2387  ;;  %v1299_v38 = vmul.f32 1.442695, %v3348_v33 }
 0x38b   : > { %v1301_v44 = vmul.f32 1.442695, %v3351_v36  ;;  %v3357_v51 = vsel %vm4032_vm4, %v2388_v12, 0.0 }
 0x38c   : > { %2389 = vpow2.f32 %v1299_v38  ;;  %v1224_v52 = vpop.xlane.xlu2 %1223  ;;  %v1142_v57 = vpop.xlane.xlu1 %1141  ;;  %v1341_v58 = vsel %vm4033_vm6, %v3357_v51, 0.0  ;;  %v1501_v1 = vsel %vm3059_vm9, %v3357_v51, 0.0  ;;  %vm4038_vm6 = vmmov %vm4031_vm5 }
 0x38d   : > { %2391 = vpow2.f32 %v1301_v44  ;;  %v1248_v8 = vsel %vm3059_vm9, %v1224_v52, 0.0  ;;  %v1166_v9 = vsel %vm4034_vm8, %v1142_v57, 0.0  ;;  %1361 = vadd.xlane.f32.xlu0 %v1341_v58  ;;  %1521 = vadd.xlane.f32.xlu1 %v1501_v1  ;;  %vm4039_vm8 = vmmov %vm4031_vm5 }
 0x38e   : > { %v1264_v10 = vadd.f32 %v1248_v8, %v1166_v9 }
 0x390   : > { %v3370_v48 = vsub.f32 %v3173_v55, %v1264_v10 }
 0x392   : > { %v2390_v14 = vpop.eup %2389  ;;  %v1303_v15 = vmul.f32 1.442695, %v3370_v48 }
 0x393   : > { %v2392_v24 = vpop.eup %2391  ;;  %v3375_v28 = vsel %vm4035_vm11, %v2390_v14, 0.0  ;;  %vm4040_vm11 = vmmov %vm4031_vm5 }
 0x394   : > { %2393 = vpow2.f32 %v1303_v15  ;;  %v1144_v12 = vpop.xlane.xlu2 %1143  ;;  %v1226_v38 = vpop.xlane.xlu0 %1225  ;;  %v1502_v44 = vsel %vm3059_vm9, %v3375_v28, 0.0  ;;  %v1342_v52 = vsel %vm4036_vm12, %v3375_v28, 0.0  ;;  %v3385_v57 = vsel %vm4037_vm15, %v2392_v24, 0.0  ;;  %vm4041_vm12 = vmmov %vm4032_vm4 }
 0x395   : > { %v1167_v58 = vsel %vm4031_vm5, %v1144_v12, 0.0  ;;  %v1249_v1 = vsel %vm3059_vm9, %v1226_v38, 0.0  ;;  %1523 = vadd.xlane.f32.xlu2 %v1502_v44  ;;  %1363 = vadd.xlane.f32.xlu1 %v1342_v52  ;;  %v1503_v8 = vsel %vm3059_vm9, %v3385_v57, 0.0  ;;  %vm4042_vm15 = vmmov %vm4031_vm5 }
 0x396   : > { %v1265_v9 = vadd.f32 %v1249_v1, %v1167_v58  ;;  %1525 = vadd.xlane.f32.xlu0 %v1503_v8  ;;  %v1343_v58 = vsel %vm4039_vm8, %v3385_v57, 0.0  ;;  %vm4044_vm8 = vmmov %vm4031_vm5 }
 0x398   : > { %v3395_v10 = vsub.f32 %v3182_v61, %v1265_v9 }
 0x39a   : > { %v2394_v14 = vpop.eup %2393  ;;  %v1305_v15 = vmul.f32 1.442695, %v3395_v10 }
 0x39b   : > { %v3400_v24 = vsel %vm4032_vm4, %v2394_v14, 0.0 }
 0x39c   : > { %2395 = vpow2.f32 %v1305_v15  ;;  %v1228_v12 = vpop.xlane.xlu1 %1227  ;;  %v1146_v38 = vpop.xlane.xlu0 %1145  ;;  %v1504_v44 = vsel %vm3059_vm9, %v3400_v24, 0.0  ;;  %v1344_v52 = vsel %vm4038_vm6, %v3400_v24, 0.0  ;;  %vm4043_vm6 = vmmov %vm4031_vm5 }
 0x39d   : > { %v1250_v1 = vsel %vm3059_vm9, %v1228_v12, 0.0  ;;  %v1168_v8 = vsel %vm4040_vm11, %v1146_v38, 0.0  ;;  %1527 = vadd.xlane.f32.xlu1 %v1504_v44  ;;  %1365 = vadd.xlane.f32.xlu2 %v1343_v58  ;;  %vm4045_vm11 = vmmov %vm4032_vm4 }
 0x39e   : > { %v1266_v9 = vadd.f32 %v1250_v1, %v1168_v8  ;;  %1367 = vadd.xlane.f32.xlu0 %v1344_v52 }
 0x3a0   : > { %v3416_v14 = vsub.f32 %v3191_v6, %v1266_v9 }
 0x3a2   : > { %v2396_v15 = vpop.eup %2395  ;;  %v1307_v61 = vmul.f32 1.442695, %v3416_v14 }
 0x3a3   : > { %v3421_v55 = vsel %vm4041_vm12, %v2396_v15, 0.0  ;;  %vm4046_vm12 = vmmov %vm4031_vm5 }
 0x3a4   : > { %2397 = vpow2.f32 %v1307_v61  ;;  %v1230_v50 = vpop.xlane.xlu2 %1229  ;;  %v1148_v12 = vpop.xlane.xlu1 %1147  ;;  %v1505_v38 = vsel %vm3059_vm9, %v3421_v55, 0.0  ;;  %v1345_v44 = vsel %vm4042_vm15, %v3421_v55, 0.0  ;;  %vm4047_vm15 = vmmov %vm4031_vm5 }
 0x3a5   : > { %v1251_v52 = vsel %vm3059_vm9, %v1230_v50, 0.0  ;;  %v1169_v58 = vsel %vm4031_vm5, %v1148_v12, 0.0  ;;  %1529 = vadd.xlane.f32.xlu2 %v1505_v38  ;;  %1369 = vadd.xlane.f32.xlu1 %v1345_v44  ;;  %vm4048_vm5 = vmmov %vm4032_vm4 }
 0x3a6   : > { %v1267_v1 = vadd.f32 %v1251_v52, %v1169_v58 }
 0x3a8   : > { %v3434_v61 = vsub.f32 %v3200_v11, %v1267_v1 }
 0x3aa   : > { %v2398_v8 = vpop.eup %2397  ;;  %v1309_v9 = vmul.f32 1.442695, %v3434_v61 }
 0x3ab   : > { %v3439_v15 = vsel %vm4032_vm4, %v2398_v8, 0.0  ;;  %vm4049_vm4 = vmmov %vm4043_vm6 }
 0x3ac   : > { %2399 = vpow2.f32 %v1309_v9  ;;  %v1150_v6 = vpop.xlane.xlu2 %1149  ;;  %v1232_v46 = vpop.xlane.xlu0 %1231  ;;  %v1506_v50 = vsel %vm3059_vm9, %v3439_v15, 0.0  ;;  %v1346_v12 = vsel %vm4043_vm6, %v3439_v15, 0.0  ;;  %vm4050_vm6 = vmmov %vm4049_vm4 }
 0x3ad   : > { %v1170_v38 = vsel %vm4044_vm8, %v1150_v6, 0.0  ;;  %v1252_v44 = vsel %vm3059_vm9, %v1232_v46, 0.0  ;;  %1531 = vadd.xlane.f32.xlu0 %v1506_v50  ;;  %1371 = vadd.xlane.f32.xlu2 %v1346_v12  ;;  %vm4051_vm8 = vmmov %vm4048_vm5 }
 0x3ae   : > { %v1268_v52 = vadd.f32 %v1252_v44, %v1170_v38 }
 0x3b0   : > { %v3452_v58 = vsub.f32 %v3209_v21, %v1268_v52 }
 0x3b2   : > { %v2400_v1 = vpop.eup %2399  ;;  %v1311_v8 = vmul.f32 1.442695, %v3452_v58 }
 0x3b3   : > { %v3457_v9 = vsel %vm4045_vm11, %v2400_v1, 0.0  ;;  %vm4052_vm11 = vmmov %vm4049_vm4 }
 0x3b4   : > { %2401 = vpow2.f32 %v1311_v8  ;;  %v1234_v11 = vpop.xlane.xlu1 %1233  ;;  %v1152_v40 = vpop.xlane.xlu0 %1151  ;;  %v1507_v46 = vsel %vm3059_vm9, %v3457_v9, 0.0  ;;  %v1347_v6 = vsel %vm4046_vm12, %v3457_v9, 0.0  ;;  %vm4053_vm12 = vmmov %vm4049_vm4 }
 0x3b5   : > { %v1253_v50 = vsel %vm3059_vm9, %v1234_v11, 0.0  ;;  %v1171_v12 = vsel %vm4047_vm15, %v1152_v40, 0.0  ;;  %1533 = vadd.xlane.f32.xlu1 %v1507_v46  ;;  %1373 = vadd.xlane.f32.xlu0 %v1347_v6  ;;  %vm4054_vm15 = vmmov %vm4048_vm5 }
 0x3b6   : > { %v1269_v38 = vadd.f32 %v1253_v50, %v1171_v12 }
 0x3b8   : > { %v3470_v44 = vsub.f32 %v3218_v32, %v1269_v38 }
 0x3ba   : > { %v2402_v52 = vpop.eup %2401  ;;  %v1313_v1 = vmul.f32 1.442695, %v3470_v44 }
 0x3bb   : > { %v3475_v8 = vsel %vm4048_vm5, %v2402_v52, 0.0  ;;  %vm4055_vm5 = vmmov %vm4049_vm4 }
 0x3bc   : > { %2403 = vpow2.f32 %v1313_v1  ;;  %v1236_v21 = vpop.xlane.xlu2 %1235  ;;  %v1154_v37 = vpop.xlane.xlu1 %1153  ;;  %v1508_v40 = vsel %vm3059_vm9, %v3475_v8, 0.0  ;;  %v1348_v11 = vsel %vm4049_vm4, %v3475_v8, 0.0 }
 0x3bd   : > { %v1254_v46 = vsel %vm3059_vm9, %v1236_v21, 0.0  ;;  %v1172_v6 = vsel %vm4050_vm6, %v1154_v37, 0.0  ;;  %1535 = vadd.xlane.f32.xlu2 %v1508_v40  ;;  %1375 = vadd.xlane.f32.xlu1 %v1348_v11  ;;  %vm4057_vm6 = vmmov %vm4051_vm8 }
 0x3be   : > { %v1270_v50 = vadd.f32 %v1254_v46, %v1172_v6 }
 0x3c0   : > { %v3488_v12 = vsub.f32 %v3227_v19, %v1270_v50 }
 0x3c2   : > { %v2404_v38 = vpop.eup %2403  ;;  %v1315_v52 = vmul.f32 1.442695, %v3488_v12 }
 0x3c3   : > { %v3493_v1 = vsel %vm4051_vm8, %v2404_v38, 0.0  ;;  %vm4058_vm8 = vmmov %vm4049_vm4 }
 0x3c4   : > { %2405 = vpow2.f32 %v1315_v52  ;;  %v1156_v32 = vpop.xlane.xlu2 %1155  ;;  %v1238_v7 = vpop.xlane.xlu0 %1237  ;;  %v1509_v37 = vsel %vm3059_vm9, %v3493_v1, 0.0  ;;  %v1349_v21 = vsel %vm4052_vm11, %v3493_v1, 0.0  ;;  %vm4059_vm11 = vmmov %vm4057_vm6 }
 0x3c5   : > { %v1173_v40 = vsel %vm4053_vm12, %v1156_v32, 0.0  ;;  %v1255_v11 = vsel %vm3059_vm9, %v1238_v7, 0.0  ;;  %1537 = vadd.xlane.f32.xlu0 %v1509_v37  ;;  %1377 = vadd.xlane.f32.xlu2 %v1349_v21  ;;  %vm4061_vm12 = vmmov %vm4049_vm4 }
 0x3c6   : > { %v1271_v46 = vadd.f32 %v1255_v11, %v1173_v40 }
 0x3c8   : > { %v3506_v6 = vsub.f32 %v3240_v45, %v1271_v46 }
 0x3ca   : > { %v2406_v50 = vpop.eup %2405  ;;  %v1317_v38 = vmul.f32 1.442695, %v3506_v6 }
 0x3cb   : > { %v3511_v52 = vsel %vm4054_vm15, %v2406_v50, 0.0  ;;  %vm4062_vm15 = vmmov %vm4049_vm4 }
 0x3cc   : > { %2407 = vpow2.f32 %v1317_v38  ;;  %v1240_v19 = vpop.xlane.xlu1 %1239  ;;  %v1158_v26 = vpop.xlane.xlu0 %1157  ;;  %v1510_v7 = vsel %vm3059_vm9, %v3511_v52, 0.0  ;;  %v1350_v32 = vsel %vm4055_vm5, %v3511_v52, 0.0  ;;  %vm4063_vm5 = vmmov %vm4049_vm4 }
 0x3cd   : > { %v1256_v37 = vsel %vm3059_vm9, %v1240_v19, 0.0  ;;  %v1174_v21 = vsel %vm4049_vm4, %v1158_v26, 0.0  ;;  %1539 = vadd.xlane.f32.xlu1 %v1510_v7  ;;  %1379 = vadd.xlane.f32.xlu0 %v1350_v32 }
 0x3ce   : > { %v1272_v40 = vadd.f32 %v1256_v37, %v1174_v21 }
 0x3d0   : > { %v3524_v11 = vsub.f32 %v3255_v59, %v1272_v40 }
 0x3d2   : > { %4056 = vst [vmem:[#allocation25_spill] sm:$0xff] %v3524_v11  ;;  %v2408_v46 = vpop.eup %2407  ;;  %v1319_v50 = vmul.f32 1.442695, %v3524_v11 }
 0x3d3   : > { %v3529_v38 = vsel %vm4057_vm6, %v2408_v46, 0.0  ;;  %vm4064_vm6 = vmmov %vm4049_vm4 }
 0x3d4   : > { %2409 = vpow2.f32 %v1319_v50  ;;  %v1511_v19 = vsel %vm3059_vm9, %v3529_v38, 0.0  ;;  %v1351_v26 = vsel %vm4058_vm8, %v3529_v38, 0.0  ;;  %vm4066_vm8 = vmmov %vm4049_vm4 }
 0x3d5   : > { %1541 = vadd.xlane.f32.xlu2 %v1511_v19  ;;  %1381 = vadd.xlane.f32.xlu1 %v1351_v26 }
 0x3d8   : > { %v1354_v7 = vpop.xlane.xlu2 %1353  ;;  %v1514_v32 = vpop.xlane.xlu0 %1513 }
 0x3d9   : > { %2411 = vlog2.f32 %v1354_v7 }
 0x3da   : > { %v2410_v37 = vpop.eup %2409  ;;  %2413 = vrcp.f32 %v1354_v7 }
 0x3db   : > { %2415 = vlog2.f32 %v1514_v32  ;;  %v3539_v21 = vsel %vm4059_vm11, %v2410_v37, 0.0 }
 0x3dc   : > { %4060 = vst [vmem:[#allocation26_spill] sm:$0xff] %v3539_v21  ;;  %2417 = vrcp.f32 %v1514_v32  ;;  %v1512_v40 = vsel %vm3059_vm9, %v3539_v21, 0.0  ;;  %v1352_v46 = vsel %vm4061_vm12, %v3539_v21, 0.0 }
 0x3dd   : > { %1543 = vadd.xlane.f32.xlu0 %v1512_v40  ;;  %1383 = vadd.xlane.f32.xlu2 %v1352_v46 }
 0x3df   : > { %v2412_v50 = vpop.eup %2411 }
 0x3e0   : > { %v2414_v19 = vpop.eup %2413  ;;  %v1386_v26 = vmul.f32 0.6931472, %v2412_v50  ;;  %v1516_v7 = vpop.xlane.xlu1 %1515 }
 0x3e1   : > { %v1356_v59 = vpop.xlane.xlu0 %1355  ;;  %v2416_v45 = vpop.eup %2415  ;;  %2419 = vlog2.f32 %v1516_v7  ;;  %v1465_v32 = vsel %vm4062_vm15, %v2414_v19, 0.0 }
 0x3e2   : > { %v2418_v37 = vpop.eup %2417  ;;  %v1546_v49 = vmul.f32 0.6931472, %v2416_v45  ;;  %2421 = vrcp.f32 %v1516_v7  ;;  %v1417_v43 = vsel %vm4063_vm5, %v1386_v26, 0.0 }
 0x3e3   : > { %2423 = vlog2.f32 %v1356_v59  ;;  %v1625_v40 = vsel %vm3059_vm9, %v2418_v37, 0.0 }
 0x3e4   : > { %2425 = vrcp.f32 %v1356_v59  ;;  %v1577_v46 = vsel %vm3059_vm9, %v1546_v49, 0.0  ;;  %v1641_v50 = vadd.f32 %v1625_v40, %v1465_v32 }
 0x3e5   : > { %v1593_v21 = vadd.f32 %v1577_v46, %v1417_v43 }
 0x3e6   : > { %v1673_v19 = vmul.f32 %v1641_v50, %v3277_v27 }
 0x3e7   : > { %v2420_v11 = vpop.eup %2419  ;;  %v1657_v17 = vsub.f32 %v3258_v63, %v1593_v21 }
 0x3e8   : > { %v2422_v45 = vpop.eup %2421  ;;  %v1548_v7 = vmul.f32 0.6931472, %v2420_v11  ;;  %v1518_v39 = vpop.xlane.xlu2 %1517 }
 0x3e9   : > { %v1358_v42 = vpop.xlane.xlu1 %1357  ;;  %v2424_v26 = vpop.eup %2423  ;;  %2427 = vlog2.f32 %v1518_v39  ;;  %v1913_v37 = vsel %vm3015_vm10, %v1657_v17, 0.0  ;;  %v1689_v59 = vmul.f32 %v1673_v19, %v1657_v17  ;;  %v1626_v49 = vsel %vm3059_vm9, %v2422_v45, 0.0  ;;  %vm4065_vm10 = vmmov %vm4049_vm4 }
 0x3ea   : > { %v2426_v32 = vpop.eup %2425  ;;  %v1388_v43 = vmul.f32 0.6931472, %v2424_v26  ;;  %1929 = vadd.xlane.f32.xlu2 %v1913_v37  ;;  %v1578_v63 = vsel %vm3059_vm9, %v1548_v7, 0.0  ;;  %2429 = vlog2.f32 %v1358_v42 }
 0x3eb   : > { %1705 = vadd.xlane.f32.xlu1 %v1689_v59  ;;  %v1466_v27 = vsel %vm4049_vm4, %v2426_v32, 0.0  ;;  %2431 = vrcp.f32 %v1518_v39 }
 0x3ec   : > { %v1418_v11 = vsel %vm4064_vm6, %v1388_v43, 0.0  ;;  %v1642_v60 = vadd.f32 %v1626_v49, %v1466_v27  ;;  %2433 = vrcp.f32 %v1358_v42  ;;  %vm4077_vm6 = vnez %v3967_v2 }
 0x3ed   : > { %v1594_v17 = vadd.f32 %v1578_v63, %v1418_v11 }
 0x3ee   : > { %v1674_v46 = vmul.f32 %v1642_v60, %v3295_v53 }
 0x3ef   : > { %v2428_v21 = vpop.eup %2427  ;;  %v1658_v40 = vsub.f32 %v3272_v20, %v1594_v17 }
 0x3f0   : > { %v1550_v50 = vmul.f32 0.6931472, %v2428_v21  ;;  %v2430_v19 = vpop.eup %2429 }
 0x3f1   : > { %v1914_v45 = vsel %vm3115_vm14, %v1658_v40, 0.0  ;;  %v1690_v7 = vmul.f32 %v1674_v46, %v1658_v40  ;;  %v1390_v26 = vmul.f32 0.6931472, %v2430_v19  ;;  %v2432_v59 = vpop.eup %2431  ;;  %vm4067_vm14 = vmmov %vm4049_vm4 }
 0x3f2   : > { %v1579_v37 = vsel %vm3059_vm9, %v1550_v50, 0.0  ;;  %v2434_v39 = vpop.eup %2433  ;;  %v1627_v34 = vsel %vm3059_vm9, %v2432_v59, 0.0 }
 0x3f3   : > { %1931 = vadd.xlane.f32.xlu1 %v1914_v45  ;;  %1707 = vadd.xlane.f32.xlu2 %v1690_v7  ;;  %v1419_v42 = vsel %vm4065_vm10, %v1390_v26, 0.0  ;;  %v1467_v49 = vsel %vm4066_vm8, %v2434_v39, 0.0 }
 0x3f4   : > { %v1595_v20 = vadd.f32 %v1579_v37, %v1419_v42  ;;  %v1643_v27 = vadd.f32 %v1627_v34, %v1467_v49 }
 0x3f6   : > { %v1659_v53 = vsub.f32 %v3290_v47, %v1595_v20  ;;  %v1675_v11 = vmul.f32 %v1643_v27, %v3305_v3 }
 0x3f8   : > { %v1360_v32 = vpop.xlane.xlu2 %1359  ;;  %v1520_v43 = vpop.xlane.xlu0 %1519  ;;  %v1915_v63 = vsel %vm3068_vm3, %v1659_v53, 0.0  ;;  %v1691_v40 = vmul.f32 %v1675_v11, %v1659_v53  ;;  %vm4068_vm3 = vmmov %vm4049_vm4 }
 0x3f9   : > { %2435 = vlog2.f32 %v1360_v32  ;;  %1933 = vadd.xlane.f32.xlu0 %v1915_v63  ;;  %vm4069_vm11 = vmmov %vm4068_vm3 }
 0x3fa   : > { %2437 = vrcp.f32 %v1360_v32  ;;  %vm4071_vm12 = vmmov %vm4068_vm3 }
 0x3fb   : > { %2439 = vlog2.f32 %v1520_v43 }
 0x3fc   : > { %2441 = vrcp.f32 %v1520_v43 }
 0x3ff   : > { %v2436_v47 = vpop.eup %2435 }
 0x400   : > { %v2438_v60 = vpop.eup %2437  ;;  %v1392_v17 = vmul.f32 0.6931472, %v2436_v47  ;;  %v1522_v21 = vpop.xlane.xlu1 %1521 }
 0x401   : > { %v1362_v46 = vpop.xlane.xlu0 %1361  ;;  %v2440_v50 = vpop.eup %2439  ;;  %2443 = vlog2.f32 %v1522_v21  ;;  %v1468_v19 = vsel %vm4067_vm14, %v2438_v60, 0.0  ;;  %1709 = vadd.xlane.f32.xlu0 %v1691_v40  ;;  %vm4080_vm14 = vnez %v3980_v22 }
 0x402   : > { %v2442_v16 = vpop.eup %2441  ;;  %v1552_v45 = vmul.f32 0.6931472, %v2440_v50  ;;  %2445 = vrcp.f32 %v1522_v21  ;;  %v1420_v7 = vsel %vm4068_vm3, %v1392_v17, 0.0 }
 0x403   : > { %2447 = vlog2.f32 %v1362_v46  ;;  %v1628_v3 = vsel %vm3059_vm9, %v2442_v16, 0.0 }
 0x404   : > { %2449 = vrcp.f32 %v1362_v46  ;;  %v1580_v26 = vsel %vm3059_vm9, %v1552_v45, 0.0  ;;  %v1644_v37 = vadd.f32 %v1628_v3, %v1468_v19 }
 0x405   : > { %v1596_v59 = vadd.f32 %v1580_v26, %v1420_v7 }
 0x406   : > { %v1676_v20 = vmul.f32 %v1644_v37, %v3331_v54 }
 0x407   : > { %v2444_v39 = vpop.eup %2443  ;;  %v1660_v42 = vsub.f32 %v3318_v25, %v1596_v59 }
 0x408   : > { %v2446_v53 = vpop.eup %2445  ;;  %v1554_v49 = vmul.f32 0.6931472, %v2444_v39  ;;  %v1524_v34 = vpop.xlane.xlu2 %1523 }
 0x409   : > { %v1364_v32 = vpop.xlane.xlu1 %1363  ;;  %v2448_v43 = vpop.eup %2447  ;;  %2451 = vlog2.f32 %v1524_v34  ;;  %v1916_v63 = vsel %vm3021_vm13, %v1660_v42, 0.0  ;;  %v1692_v11 = vmul.f32 %v1676_v20, %v1660_v42  ;;  %v1629_v47 = vsel %vm3059_vm9, %v2446_v53, 0.0  ;;  %vm4070_vm13 = vmmov %vm4068_vm3 }
 0x40a   : > { %v1526_v27 = vpop.xlane.xlu0 %1525  ;;  %v2450_v60 = vpop.eup %2449  ;;  %v1394_v17 = vmul.f32 0.6931472, %v2448_v43  ;;  %2453 = vrcp.f32 %v1524_v34  ;;  %1935 = vadd.xlane.f32.xlu2 %v1916_v63  ;;  %v1581_v25 = vsel %vm3059_vm9, %v1554_v49, 0.0 }
 0x40b   : > { %2455 = vlog2.f32 %v1364_v32  ;;  %1711 = vadd.xlane.f32.xlu1 %v1692_v11  ;;  %v1469_v54 = vsel %vm4069_vm11, %v2450_v60, 0.0 }
 0x40c   : > { %2457 = vrcp.f32 %v1364_v32  ;;  %v1421_v62 = vsel %vm4070_vm13, %v1394_v17, 0.0  ;;  %v1645_v21 = vadd.f32 %v1629_v47, %v1469_v54 }
 0x40d   : > { %2459 = vlog2.f32 %v1526_v27  ;;  %v1597_v40 = vadd.f32 %v1581_v25, %v1421_v62 }
 0x40e   : > { %v1677_v19 = vmul.f32 %v1645_v21, %v3357_v51  ;;  %2461 = vrcp.f32 %v1526_v27 }
 0x40f   : > { %v2452_v46 = vpop.eup %2451  ;;  %v1661_v50 = vsub.f32 %v3326_v30, %v1597_v40 }
 0x410   : > { %v2454_v16 = vpop.eup %2453  ;;  %v1556_v45 = vmul.f32 0.6931472, %v2452_v46  ;;  %v1366_v3 = vpop.xlane.xlu2 %1365 }
 0x411   : > { %v1528_v7 = vpop.xlane.xlu1 %1527  ;;  %v2456_v26 = vpop.eup %2455  ;;  %v1917_v37 = vsel %vm3028_vm0, %v1661_v50, 0.0  ;;  %v1693_v59 = vmul.f32 %v1677_v19, %v1661_v50  ;;  %v1630_v39 = vsel %vm3059_vm9, %v2454_v16, 0.0  ;;  %vm4072_vm0 = vmmov %vm4068_vm3 }
 0x412   : > { %2463 = vlog2.f32 %v1528_v7  ;;  %v2458_v42 = vpop.eup %2457  ;;  %v1582_v30 = vsel %vm3059_vm9, %v1556_v45, 0.0  ;;  %v1396_v20 = vmul.f32 0.6931472, %v2456_v26  ;;  %v1368_v51 = vpop.xlane.xlu0 %1367  ;;  %vm4073_vm15 = vmmov %vm4072_vm0 }
 0x413   : > { %2465 = vrcp.f32 %v1528_v7  ;;  %v2460_v53 = vpop.eup %2459  ;;  %1937 = vadd.xlane.f32.xlu1 %v1917_v37  ;;  %1713 = vadd.xlane.f32.xlu2 %v1693_v59  ;;  %v1470_v49 = vsel %vm4071_vm12, %v2458_v42, 0.0  ;;  %vm4075_vm5 = vmmov %vm4072_vm0 }
 0x414   : > { %2467 = vlog2.f32 %v1366_v3  ;;  %v1422_v0 = vsel %vm4072_vm0, %v1396_v20, 0.0  ;;  %v1646_v34 = vadd.f32 %v1630_v39, %v1470_v49  ;;  %v2462_v43 = vpop.eup %2461  ;;  %v1558_v63 = vmul.f32 0.6931472, %v2460_v53  ;;  %vm4076_vm4 = vmmov %vm4072_vm0 }
 0x415   : > { %2469 = vrcp.f32 %v1366_v3  ;;  %v1598_v32 = vadd.f32 %v1582_v30, %v1422_v0  ;;  %vm4078_vm10 = vmmov %vm4072_vm0 }
 0x416   : > { %2471 = vlog2.f32 %v1368_v51  ;;  %v1678_v47 = vmul.f32 %v1646_v34, %v3375_v28  ;;  %v1583_v19 = vsel %vm3059_vm9, %v1558_v63, 0.0  ;;  %vm4079_vm8 = vmmov %vm4072_vm0 }
 0x417   : > { %2473 = vrcp.f32 %v1368_v51  ;;  %v1662_v11 = vsub.f32 %v3348_v33, %v1598_v32  ;;  %v1631_v33 = vsel %vm3059_vm9, %v2462_v43, 0.0  ;;  %vm4081_vm3 = vmmov %vm4072_vm0 }
 0x418   : > { %v2464_v27 = vpop.eup %2463  ;;  %v1530_v25 = vpop.xlane.xlu2 %1529  ;;  %vm4082_vm11 = vmmov %vm4072_vm0 }
 0x419   : > { %v2466_v60 = vpop.eup %2465  ;;  %v1560_v17 = vmul.f32 0.6931472, %v2464_v27  ;;  %v1370_v54 = vpop.xlane.xlu1 %1369  ;;  %2475 = vlog2.f32 %v1530_v25  ;;  %v1694_v21 = vmul.f32 %v1678_v47, %v1662_v11  ;;  %v1918_v40 = vsel %vm3078_vm2, %v1662_v11, 0.0  ;;  %vm4074_vm2 = vmmov %vm4072_vm0 }
 0x41a   : > { %v2468_v62 = vpop.eup %2467  ;;  %2477 = vrcp.f32 %v1530_v25  ;;  %v1632_v45 = vsel %vm3059_vm9, %v2466_v60, 0.0  ;;  %vm4084_vm13 = vmmov %vm4072_vm0 }
 0x41b   : > { %v2470_v46 = vpop.eup %2469  ;;  %v1398_v50 = vmul.f32 0.6931472, %v2468_v62  ;;  %v1584_v16 = vsel %vm3059_vm9, %v1560_v17, 0.0  ;;  %2479 = vlog2.f32 %v1370_v54  ;;  %1715 = vadd.xlane.f32.xlu0 %v1694_v21  ;;  %1939 = vadd.xlane.f32.xlu2 %v1918_v40  ;;  %vm4085_vm12 = vmmov %vm4072_vm0  ;;  %vm4086_vm0 = vnez %v3982_v23 }
 0x41c   : > { %v2472_v28 = vpop.eup %2471  ;;  %v1471_v18 = vsel %vm4073_vm15, %v2470_v46, 0.0  ;;  %2481 = vrcp.f32 %v1370_v54  ;;  %vm4087_vm15 = vmmov %vm4074_vm2 }
 0x41d   : > { %v2474_v7 = vpop.eup %2473  ;;  %v1400_v3 = vmul.f32 0.6931472, %v2472_v28  ;;  %v1423_v26 = vsel %vm4074_vm2, %v1398_v50, 0.0  ;;  %v1647_v37 = vadd.f32 %v1631_v33, %v1471_v18 }
 0x41e   : > { %v1599_v59 = vadd.f32 %v1583_v19, %v1423_v26  ;;  %v1472_v39 = vsel %vm4075_vm5, %v2474_v7, 0.0  ;;  %vm4088_vm5 = vmmov %vm4074_vm2 }
 0x41f   : > { %v1424_v42 = vsel %vm4076_vm4, %v1400_v3, 0.0  ;;  %v1648_v30 = vadd.f32 %v1632_v45, %v1472_v39  ;;  %v2476_v20 = vpop.eup %2475  ;;  %v1679_v53 = vmul.f32 %v1647_v37, %v3385_v57  ;;  %vm4089_vm4 = vmmov %vm4074_vm2 }
 0x420   : > { %v1663_v51 = vsub.f32 %v3351_v36, %v1599_v59  ;;  %v1600_v49 = vadd.f32 %v1584_v16, %v1424_v42  ;;  %v2478_v0 = vpop.eup %2477  ;;  %v1562_v34 = vmul.f32 0.6931472, %v2476_v20  ;;  %v1372_v32 = vpop.xlane.xlu2 %1371 }
 0x421   : > { %v1532_v43 = vpop.xlane.xlu0 %1531  ;;  %v1680_v63 = vmul.f32 %v1648_v30, %v3400_v24  ;;  %v2480_v27 = vpop.eup %2479  ;;  %2483 = vlog2.f32 %v1372_v32  ;;  %v1633_v25 = vsel %vm3059_vm9, %v2478_v0, 0.0 }
 0x422   : > { %v1919_v11 = vsel %vm4077_vm6, %v1663_v51, 0.0  ;;  %v1695_v47 = vmul.f32 %v1679_v53, %v1663_v51  ;;  %v1664_v60 = vsub.f32 %v3370_v48, %v1600_v49  ;;  %v2482_v17 = vpop.eup %2481  ;;  %v1585_v36 = vsel %vm3059_vm9, %v1562_v34, 0.0  ;;  %vm4091_vm6 = vmmov %vm4074_vm2 }
 0x423   : > { %v1402_v57 = vmul.f32 0.6931472, %v2480_v27  ;;  %2485 = vrcp.f32 %v1372_v32  ;;  %1941 = vadd.xlane.f32.xlu0 %v1919_v11  ;;  %v1473_v2 = vsel %vm4078_vm10, %v2482_v17, 0.0  ;;  %vm4092_vm10 = vmmov %vm4074_vm2 }
 0x424   : > { %2487 = vlog2.f32 %v1532_v43  ;;  %1717 = vadd.xlane.f32.xlu1 %v1695_v47  ;;  %v1696_v24 = vmul.f32 %v1680_v63, %v1664_v60  ;;  %v1649_v48 = vadd.f32 %v1633_v25, %v1473_v2  ;;  %v1920_v45 = vsel %vm4080_vm14, %v1664_v60, 0.0  ;;  %vm4094_vm14 = vmmov %vm4074_vm2 }
 0x425   : > { %v1425_v54 = vsel %vm4079_vm8, %v1402_v57, 0.0  ;;  %2489 = vrcp.f32 %v1532_v43  ;;  %vm4093_vm8 = vmmov %vm4074_vm2 }
 0x426   : > { %1719 = vadd.xlane.f32.xlu2 %v1696_v24  ;;  %v1601_v62 = vadd.f32 %v1585_v36, %v1425_v54  ;;  %v1681_v46 = vmul.f32 %v1649_v48, %v3421_v55 }
 0x427   : > { %v2484_v21 = vpop.eup %2483 }
 0x428   : > { %v1665_v40 = vsub.f32 %v3395_v10, %v1601_v62  ;;  %v1404_v19 = vmul.f32 0.6931472, %v2484_v21  ;;  %v1534_v33 = vpop.xlane.xlu1 %1533 }
 0x429   : > { %v2486_v50 = vpop.eup %2485  ;;  %v1374_v28 = vpop.xlane.xlu0 %1373  ;;  %2491 = vlog2.f32 %v1534_v33 }
 0x42a   : > { %v2488_v16 = vpop.eup %2487  ;;  %v1697_v18 = vmul.f32 %v1681_v46, %v1665_v40  ;;  %v1474_v7 = vsel %vm4081_vm3, %v2486_v50, 0.0  ;;  %2493 = vrcp.f32 %v1534_v33  ;;  %v1921_v10 = vsel %vm3122_vm7, %v1665_v40, 0.0 }
 0x42b   : > { %v2490_v3 = vpop.eup %2489  ;;  %v1564_v26 = vmul.f32 0.6931472, %v2488_v16  ;;  %v1426_v55 = vsel %vm4082_vm11, %v1404_v19, 0.0  ;;  %2495 = vlog2.f32 %v1374_v28  ;;  %vm4083_vm7 = vnez %v3969_v4 }
 0x42c   : > { %1721 = vadd.xlane.f32.xlu0 %v1697_v18  ;;  %1943 = vadd.xlane.f32.xlu1 %v1920_v45  ;;  %v1634_v37 = vsel %vm3059_vm9, %v2490_v3, 0.0  ;;  %2497 = vrcp.f32 %v1374_v28  ;;  %vm1831_vm3 = vcmp.eq.s32.totalorder %v3002_v56, %v2986_v29  ;;  %vm1895_vm11 = vcmp.eq.s32.totalorder %v3002_v56, %v3237_v41 }
 0x42d   : > { %v1586_v22 = vsel %vm3059_vm9, %v1564_v26, 0.0  ;;  %v1650_v59 = vadd.f32 %v1634_v37, %v1474_v7 }
 0x42e   : > { %1945 = vadd.xlane.f32.xlu2 %v1921_v10  ;;  %v1602_v39 = vadd.f32 %v1586_v22, %v1426_v55 }
 0x42f   : > { %v2492_v42 = vpop.eup %2491  ;;  %v1682_v30 = vmul.f32 %v1650_v59, %v3439_v15 }
 0x430   : > { %v1666_v35 = vsub.f32 %v3416_v14, %v1602_v39  ;;  %v2494_v20 = vpop.eup %2493  ;;  %v1566_v51 = vmul.f32 0.6931472, %v2492_v42  ;;  %v1536_v53 = vpop.xlane.xlu2 %1535 }
 0x431   : > { %v1376_v49 = vpop.xlane.xlu1 %1375  ;;  %v2496_v0 = vpop.eup %2495  ;;  %2499 = vlog2.f32 %v1536_v53  ;;  %v1635_v43 = vsel %vm3059_vm9, %v2494_v20, 0.0 }
 0x432   : > { %v1922_v34 = vsel %vm4083_vm7, %v1666_v35, 0.0  ;;  %v1698_v32 = vmul.f32 %v1682_v30, %v1666_v35  ;;  %v2498_v63 = vpop.eup %2497  ;;  %v1406_v27 = vmul.f32 0.6931472, %v2496_v0  ;;  %2501 = vrcp.f32 %v1536_v53  ;;  %vm1911_vm7 = vmor %vm1831_vm3, %vm1895_vm11 }
 0x433   : > { %v1587_v14 = vsel %vm3059_vm9, %v1566_v51, 0.0  ;;  %2503 = vlog2.f32 %v1376_v49  ;;  %v1475_v15 = vsel %vm4084_vm13, %v2498_v63, 0.0  ;;  %vm4095_vm13 = vmmov %vm4074_vm2 }
 0x434   : > { %1947 = vadd.xlane.f32.xlu0 %v1922_v34  ;;  %1723 = vadd.xlane.f32.xlu1 %v1698_v32  ;;  %2505 = vrcp.f32 %v1376_v49  ;;  %v1427_v4 = vsel %vm4085_vm12, %v1406_v27, 0.0  ;;  %v1651_v11 = vadd.f32 %v1635_v43, %v1475_v15  ;;  %vm4096_vm12 = vmmov %vm4074_vm2 }
 0x435   : > { %v1603_v47 = vadd.f32 %v1587_v14, %v1427_v4 }
 0x436   : > { %v1683_v36 = vmul.f32 %v1651_v11, %v3457_v9 }
 0x437   : > { %v2500_v60 = vpop.eup %2499  ;;  %v1667_v17 = vsub.f32 %v3434_v61, %v1603_v47 }
 0x438   : > { %v2502_v57 = vpop.eup %2501  ;;  %v1568_v25 = vmul.f32 0.6931472, %v2500_v60  ;;  %v1378_v24 = vpop.xlane.xlu2 %1377 }
 0x439   : > { %v1538_v2 = vpop.xlane.xlu0 %1537  ;;  %v2504_v54 = vpop.eup %2503  ;;  %2507 = vlog2.f32 %v1378_v24  ;;  %v1923_v48 = vsel %vm4086_vm0, %v1667_v17, 0.0  ;;  %v1699_v62 = vmul.f32 %v1683_v36, %v1667_v17  ;;  %v1636_v21 = vsel %vm3059_vm9, %v2502_v57, 0.0 }
 0x43a   : > { %v2506_v40 = vpop.eup %2505  ;;  %v1588_v46 = vsel %vm3059_vm9, %v1568_v25, 0.0  ;;  %v1408_v61 = vmul.f32 0.6931472, %v2504_v54  ;;  %2509 = vrcp.f32 %v1378_v24  ;;  %vm1961_vm0 = vcmp.le.s32.totalorder %v3002_v56, 8 }
 0x43b   : > { %2511 = vlog2.f32 %v1538_v2  ;;  %1725 = vadd.xlane.f32.xlu2 %v1699_v62  ;;  %v1476_v9 = vsel %vm4087_vm15, %v2506_v40, 0.0  ;;  %vm1978_vm15 = vcmp.eq.s32.totalorder %v3002_v56, 9 }
 0x43c   : > { %1949 = vadd.xlane.f32.xlu1 %v1923_v48  ;;  %v1428_v23 = vsel %vm4074_vm2, %v1408_v61, 0.0  ;;  %2513 = vrcp.f32 %v1538_v2  ;;  %v1652_v50 = vadd.f32 %v1636_v21, %v1476_v9 }
 0x43d   : > { %v1604_v19 = vadd.f32 %v1588_v46, %v1428_v23 }
 0x43e   : > { %v1684_v16 = vmul.f32 %v1652_v50, %v3475_v8 }
 0x43f   : > { %v2508_v33 = vpop.eup %2507  ;;  %v1668_v28 = vsub.f32 %v3452_v58, %v1604_v19 }
 0x440   : > { %v2510_v18 = vpop.eup %2509  ;;  %v1410_v45 = vmul.f32 0.6931472, %v2508_v33  ;;  %v1540_v7 = vpop.xlane.xlu1 %1539 }
 0x441   : > { %v1380_v3 = vpop.xlane.xlu0 %1379  ;;  %v2512_v26 = vpop.eup %2511  ;;  %2515 = vlog2.f32 %v1540_v7  ;;  %v1700_v10 = vmul.f32 %v1684_v16, %v1668_v28  ;;  %v1924_v55 = vsel %vm3132_vm1, %v1668_v28, 0.0  ;;  %v1477_v37 = vsel %vm4088_vm5, %v2510_v18, 0.0 }
 0x442   : > { %v2514_v22 = vpop.eup %2513  ;;  %v1570_v59 = vmul.f32 0.6931472, %v2512_v26  ;;  %2517 = vrcp.f32 %v1540_v7  ;;  %v1429_v58 = vsel %vm4089_vm4, %v1410_v45, 0.0  ;;  %vm4090_vm1 = vnez %v3971_v5  ;;  %v4098_v26 = vld [vmem:[#allocation21_spill] sm:$0xff] }
 0x443   : > { %2519 = vlog2.f32 %v1380_v3  ;;  %1727 = vadd.xlane.f32.xlu0 %v1700_v10  ;;  %1951 = vadd.xlane.f32.xlu2 %v1924_v55  ;;  %v1637_v8 = vsel %vm3059_vm9, %v2514_v22, 0.0  ;;  %vm1896_vm5 = vcmp.eq.s32.totalorder %v3002_v56, %v4098_v26  ;;  %vm2011_vm4 = vcmp.eq.s32.totalorder %v3002_v56, 10 }
 0x444   : > { %2521 = vrcp.f32 %v1380_v3  ;;  %v1589_v31 = vsel %vm3059_vm9, %v1570_v59, 0.0  ;;  %v1653_v39 = vadd.f32 %v1637_v8, %v1477_v37  ;;  %v4097_v3 = vld [vmem:[#allocation5_spill] sm:$0xff]  ;;  %v4099_v37 = vld [vmem:[#allocation7_spill] sm:$0xff] }
 0x445   : > { %v1605_v42 = vadd.f32 %v1589_v31, %v1429_v58  ;;  %vm1832_vm2 = vcmp.eq.s32.totalorder %v3002_v56, %v4097_v3  ;;  %v1962_v22 = vsel %vm1961_vm0, %v4099_v37, 0.0  ;;  %v4100_v31 = vld [vmem:[#allocation25_spill] sm:$0xff] }
 0x446   : > { %v1685_v20 = vmul.f32 %v1653_v39, %v3493_v1 }
 0x447   : > { %v2516_v35 = vpop.eup %2515  ;;  %v1669_v30 = vsub.f32 %v3470_v44, %v1605_v42  ;;  %v4101_v42 = vld [vmem:[#allocation26_spill] sm:$0xff] }
 0x448   : > { %v2518_v51 = vpop.eup %2517  ;;  %v1572_v53 = vmul.f32 0.6931472, %v2516_v35  ;;  %v1542_v49 = vpop.xlane.xlu2 %1541 }
 0x449   : > { %v1382_v0 = vpop.xlane.xlu1 %1381  ;;  %v2520_v34 = vpop.eup %2519  ;;  %2523 = vlog2.f32 %v1542_v49  ;;  %v1925_v32 = vsel %vm4090_vm1, %v1669_v30, 0.0  ;;  %v1701_v43 = vmul.f32 %v1685_v20, %v1669_v30  ;;  %v1638_v63 = vsel %vm3059_vm9, %v2518_v51, 0.0 }
 0x44a   : > { %v2522_v27 = vpop.eup %2521  ;;  %v1590_v14 = vsel %vm3059_vm9, %v1572_v53, 0.0  ;;  %v1412_v44 = vmul.f32 0.6931472, %v2520_v34  ;;  %2525 = vrcp.f32 %v1542_v49  ;;  %v4102_v49 = vld [vmem:[#allocation6_spill] sm:$0xff] }
 0x44b   : > { %2527 = vlog2.f32 %v1382_v0  ;;  %1953 = vadd.xlane.f32.xlu0 %v1925_v32  ;;  %1729 = vadd.xlane.f32.xlu1 %v1701_v43  ;;  %v1478_v1 = vsel %vm4091_vm6, %v2522_v27, 0.0  ;;  %vm1830_vm1 = vcmp.eq.s32.totalorder %v3002_v56, %v4102_v49  ;;  %v4104_v43 = vld [vmem:[#allocation8_spill] sm:$0xff] }
 0x44c   : > { %v1430_v5 = vsel %vm4092_vm10, %v1412_v44, 0.0  ;;  %2529 = vrcp.f32 %v1382_v0  ;;  %v1654_v15 = vadd.f32 %v1638_v63, %v1478_v1  ;;  %v4103_v0 = vld [vmem:[#allocation23_spill] sm:$0xff]  ;;  %v1963_v63 = vsel %vm1961_vm0, %v4104_v43, 0.0 }
 0x44d   : > { %v1606_v4 = vadd.f32 %v1590_v14, %v1430_v5  ;;  %vm1894_vm6 = vcmp.eq.s32.totalorder %v3002_v56, %v4103_v0 }
 0x44e   : > { %v1686_v60 = vmul.f32 %v1654_v15, %v3511_v52  ;;  %vm1910_vm10 = vmor %vm1830_vm1, %vm1894_vm6 }
 0x44f   : > { %v2524_v11 = vpop.eup %2523  ;;  %v3712_v47 = vsub.f32 %v3488_v12, %v1606_v4 }
 0x450   : > { %v2526_v17 = vpop.eup %2525  ;;  %v1574_v36 = vmul.f32 0.6931472, %v2524_v11  ;;  %v1384_v57 = vpop.xlane.xlu2 %1383 }
 0x451   : > { %v1544_v25 = vpop.xlane.xlu0 %1543  ;;  %v2528_v24 = vpop.eup %2527  ;;  %2531 = vlog2.f32 %v1384_v57  ;;  %v1702_v2 = vmul.f32 %v1686_v60, %v3712_v47  ;;  %v1639_v54 = vsel %vm3059_vm9, %v2526_v17, 0.0  ;;  %v1926_v15 = vsel %vm1910_vm10, %v3712_v47, 0.0  ;;  %v4105_v17 = vld [vmem:[#allocation9_spill] sm:$0xff] }
 0x452   : > { %v2530_v48 = vpop.eup %2529  ;;  %v1591_v62 = vsel %vm3059_vm9, %v1574_v36, 0.0  ;;  %v1414_v21 = vmul.f32 0.6931472, %v2528_v24  ;;  %2533 = vrcp.f32 %v1384_v57  ;;  %v1964_v36 = vsel %vm1961_vm0, %v4105_v17, 0.0  ;;  %v4112_v17 = vld [vmem:[#allocation16_spill] sm:$0xff] }
 0x453   : > { %2535 = vlog2.f32 %v1544_v25  ;;  %1731 = vadd.xlane.f32.xlu2 %v1702_v2  ;;  %v1479_v12 = vsel %vm4093_vm8, %v2530_v48, 0.0 }
 0x454   : > { %v1431_v52 = vsel %vm4094_vm14, %v1414_v21, 0.0  ;;  %2537 = vrcp.f32 %v1544_v25  ;;  %v1655_v40 = vadd.f32 %v1639_v54, %v1479_v12  ;;  %v4106_v54 = vld [vmem:[#allocation10_spill] sm:$0xff] }
 0x455   : > { %v1607_v46 = vadd.f32 %v1591_v62, %v1431_v52  ;;  %v1965_v48 = vsel %vm1961_vm0, %v4106_v54, 0.0 }
 0x456   : > { %v1687_v23 = vmul.f32 %v1655_v40, %v3529_v38 }
 0x457   : > { %v2532_v61 = vpop.eup %2531  ;;  %v1671_v9 = vsub.f32 %v3506_v6, %v1607_v46 }
 0x458   : > { %v2534_v50 = vpop.eup %2533  ;;  %v1416_v19 = vmul.f32 0.6931472, %v2532_v61 }
 0x459   : > { %v2536_v33 = vpop.eup %2535  ;;  %v1703_v28 = vmul.f32 %v1687_v23, %v1671_v9  ;;  %v1927_v16 = vsel %vm1911_vm7, %v1671_v9, 0.0  ;;  %v1480_v18 = vsel %vm4095_vm13, %v2534_v50, 0.0  ;;  %v4107_v23 = vld [vmem:[#allocation11_spill] sm:$0xff] }
 0x45a   : > { %v2538_v29 = vpop.eup %2537  ;;  %v1576_v45 = vmul.f32 0.6931472, %v2536_v33  ;;  %v1432_v41 = vsel %vm4096_vm12, %v1416_v19, 0.0  ;;  %v1966_v50 = vsel %vm1961_vm0, %v4107_v23, 0.0  ;;  %v4114_v23 = vld [vmem:[#allocation18_spill] sm:$0xff] }
 0x45b   : > { %1733 = vadd.xlane.f32.xlu0 %v1703_v28  ;;  %1957 = vadd.xlane.f32.xlu2 %v1927_v16  ;;  %v1640_v6 = vsel %vm3059_vm9, %v2538_v29, 0.0 }
 0x45c   : > { %v1592_v38 = vsel %vm3059_vm9, %v1576_v45, 0.0  ;;  %v1656_v7 = vadd.f32 %v1640_v6, %v1480_v18  ;;  %vm1912_vm9 = vmor %vm1832_vm2, %vm1896_vm5 }
 0x45d   : > { %v1930_v10 = vpop.xlane.xlu2 %1929  ;;  %v1608_v55 = vadd.f32 %v1592_v38, %v1432_v41  ;;  %v4108_v41 = vld [vmem:[#allocation12_spill] sm:$0xff] }
 0x45e   : > { %v1979_v59 = vsel %vm1978_vm15, %v1930_v10, 0.0  ;;  %v1706_v13 = vpop.xlane.xlu1 %1705  ;;  %v1688_v35 = vmul.f32 %v1656_v7, %v4101_v42  ;;  %v1967_v6 = vsel %vm1961_vm0, %v4108_v41, 0.0 }
 0x45f   : > { %v1995_v58 = vadd.f32 %v1979_v59, %v1962_v22  ;;  %v1737_v8 = vsub.f32 0.0, %v1706_v13  ;;  %v1672_v39 = vsub.f32 %v4100_v31, %v1608_v55  ;;  %v4109_v59 = vld [vmem:[#allocation13_spill] sm:$0xff] }
 0x460   : > { %v1968_v13 = vsel %vm1961_vm0, %v4109_v59, 0.0  ;;  %v4116_v59 = vld [vmem:[#allocation22_spill] sm:$0xff] }
 0x461   : > { %v2012_v30 = vsel %vm2011_vm4, %v1737_v8, 0.0  ;;  %v1928_v20 = vsel %vm1912_vm9, %v1672_v39, 0.0  ;;  %v1704_v51 = vmul.f32 %v1688_v35, %v1672_v39 }
 0x462   : > { %v2028_v53 = vadd.f32 %v2012_v30, %v1995_v58 }
 0x463   : > { %1959 = vadd.xlane.f32.xlu0 %v1928_v20  ;;  %1735 = vadd.xlane.f32.xlu1 %v1704_v51  ;;  %v4110_v51 = vld [vmem:[#allocation14_spill] sm:$0xff] }
 0x464   : > { %2044 = vst [vmem:[%s3757_s19] sm:$0xff] %v2028_v53  ;;  %v1969_v53 = vsel %vm1961_vm0, %v4110_v51, 0.0  ;;  %v4117_v51 = vld [vmem:[#allocation24_spill] sm:$0xff] }
 0x466   : > { %v1932_v34 = vpop.xlane.xlu1 %1931  ;;  %v1708_v32 = vpop.xlane.xlu2 %1707 }
 0x467   : > { %v1980_v27 = vsel %vm1978_vm15, %v1932_v34, 0.0  ;;  %v1738_v14 = vsub.f32 0.0, %v1708_v32 }
 0x468   : > { %v1996_v44 = vadd.f32 %v1980_v27, %v1963_v63  ;;  %v4111_v63 = vld [vmem:[#allocation15_spill] sm:$0xff] }
 0x469   : > { %v2013_v1 = vsel %vm2011_vm4, %v1738_v14, 0.0  ;;  %v1970_v27 = vsel %vm1961_vm0, %v4111_v63, 0.0 }
 0x46a   : > { %v2029_v5 = vadd.f32 %v2013_v1, %v1996_v44 }
 0x46b   : > { %1955 = vadd.xlane.f32.xlu1 %v1926_v15 }
 0x46c   : > { %2045 = vst [vmem:[%s3757_s19 + $0x8] sm:$0xff] %v2029_v5  ;;  %v1934_v4 = vpop.xlane.xlu0 %1933 }
 0x46d   : > { %v1981_v11 = vsel %vm1978_vm15, %v1934_v4, 0.0 }
 0x46e   : > { %v1997_v25 = vadd.f32 %v1981_v11, %v1964_v36  ;;  %v1971_v36 = vsel %vm1961_vm0, %v4112_v17, 0.0 }
 0x474   : > { %v1710_v60 = vpop.xlane.xlu0 %1709 }
 0x475   : > { %v1739_v57 = vsub.f32 0.0, %v1710_v60 }
 0x477   : > { %v2014_v24 = vsel %vm2011_vm4, %v1739_v57, 0.0 }
 0x478   : > { %v2030_v2 = vadd.f32 %v2014_v24, %v1997_v25 }
 0x47a   : > { %2046 = vst [vmem:[%s3757_s19 + $0x10] sm:$0xff] %v2030_v2 }
 0x47d   : > { %v1936_v47 = vpop.xlane.xlu2 %1935 }
 0x47e   : > { %v1982_v62 = vsel %vm1978_vm15, %v1936_v47, 0.0  ;;  %v1712_v21 = vpop.xlane.xlu1 %1711 }
 0x47f   : > { %v1998_v12 = vadd.f32 %v1982_v62, %v1965_v48  ;;  %v1740_v52 = vsub.f32 0.0, %v1712_v21  ;;  %v4113_v48 = vld [vmem:[#allocation17_spill] sm:$0xff] }
 0x480   : > { %v1972_v62 = vsel %vm1961_vm0, %v4113_v48, 0.0 }
 0x481   : > { %v2015_v40 = vsel %vm2011_vm4, %v1740_v52, 0.0 }
 0x482   : > { %v2031_v46 = vadd.f32 %v2015_v40, %v1998_v12 }
 0x484   : > { %2047 = vst [vmem:[%s3757_s19 + $0x18] sm:$0xff] %v2031_v46 }
 0x486   : > { %v1938_v61 = vpop.xlane.xlu1 %1937  ;;  %v1714_v9 = vpop.xlane.xlu2 %1713 }
 0x487   : > { %v1983_v19 = vsel %vm1978_vm15, %v1938_v61, 0.0  ;;  %v1741_v33 = vsub.f32 0.0, %v1714_v9 }
 0x488   : > { %v1999_v28 = vadd.f32 %v1983_v19, %v1966_v50  ;;  %v1973_v50 = vsel %vm1961_vm0, %v4114_v23, 0.0 }
 0x489   : > { %v2016_v16 = vsel %vm2011_vm4, %v1741_v33, 0.0 }
 0x48a   : > { %v2032_v18 = vadd.f32 %v2016_v16, %v1999_v28 }
 0x48c   : > { %2048 = vst [vmem:[%s3757_s19 + $0x20] sm:$0xff] %v2032_v18 }
 0x48e   : > { %v1940_v29 = vpop.xlane.xlu2 %1939  ;;  %v1716_v45 = vpop.xlane.xlu0 %1715 }
 0x48f   : > { %v1984_v38 = vsel %vm1978_vm15, %v1940_v29, 0.0  ;;  %v1742_v7 = vsub.f32 0.0, %v1716_v45 }
 0x490   : > { %v2000_v3 = vadd.f32 %v1984_v38, %v1967_v6  ;;  %v4115_v6 = vld [vmem:[#allocation19_spill] sm:$0xff] }
 0x491   : > { %v2017_v26 = vsel %vm2011_vm4, %v1742_v7, 0.0  ;;  %v1974_v38 = vsel %vm1961_vm0, %v4115_v6, 0.0 }
 0x492   : > { %v2033_v10 = vadd.f32 %v2017_v26, %v2000_v3 }
 0x494   : > { %2049 = vst [vmem:[%s3757_s19 + $0x28] sm:$0xff] %v2033_v10 }
 0x496   : > { %v1942_v37 = vpop.xlane.xlu0 %1941 }
 0x497   : > { %v1718_v55 = vpop.xlane.xlu1 %1717  ;;  %v1985_v58 = vsel %vm1978_vm15, %v1942_v37, 0.0 }
 0x498   : > { %v1743_v22 = vsub.f32 0.0, %v1718_v55  ;;  %v2001_v31 = vadd.f32 %v1985_v58, %v1968_v13  ;;  %v1976_v13 = vsel %vm1961_vm0, %v4116_v59, 0.0 }
 0x499   : > { %v1720_v8 = vpop.xlane.xlu2 %1719 }
 0x49a   : > { %v2018_v39 = vsel %vm2011_vm4, %v1743_v22, 0.0  ;;  %v1744_v35 = vsub.f32 0.0, %v1720_v8 }
 0x49b   : > { %v2034_v42 = vadd.f32 %v2018_v39, %v2001_v31 }
 0x49c   : > { %v2019_v43 = vsel %vm2011_vm4, %v1744_v35, 0.0 }
 0x49d   : > { %2050 = vst [vmem:[%s3757_s19 + $0x30] sm:$0xff] %v2034_v42 }
 0x49f   : > { %v1944_v30 = vpop.xlane.xlu1 %1943  ;;  %v1722_v20 = vpop.xlane.xlu0 %1721 }
 0x4a0   : > { %v1986_v49 = vsel %vm1978_vm15, %v1944_v30, 0.0  ;;  %v1745_v0 = vsub.f32 0.0, %v1722_v20 }
 0x4a1   : > { %v2002_v34 = vadd.f32 %v1986_v49, %v1969_v53  ;;  %v1946_v32 = vpop.xlane.xlu2 %1945  ;;  %v1977_v53 = vsel %vm1961_vm0, %v4117_v51, 0.0 }
 0x4a2   : > { %v1987_v14 = vsel %vm1978_vm15, %v1946_v32, 0.0  ;;  %v2020_v44 = vsel %vm2011_vm4, %v1745_v0, 0.0 }
 0x4a3   : > { %v2035_v1 = vadd.f32 %v2019_v43, %v2002_v34  ;;  %v2003_v5 = vadd.f32 %v1987_v14, %v1970_v27  ;;  %v4118_v27 = vld [vmem:[#allocation20_spill] sm:$0xff] }
 0x4a4   : > { %v1975_v14 = vsel %vm1961_vm0, %v4118_v27, 0.0 }
 0x4a5   : > { %2051 = vst [vmem:[%s3757_s19 + $0x38] sm:$0xff] %v2035_v1  ;;  %v2036_v15 = vadd.f32 %v2020_v44, %v2003_v5 }
 0x4a7   : > { %2052 = vst [vmem:[%s3757_s19 + $0x40] sm:$0xff] %v2036_v15  ;;  %v1724_v4 = vpop.xlane.xlu1 %1723  ;;  %v1948_v11 = vpop.xlane.xlu0 %1947 }
 0x4a8   : > { %v1746_v60 = vsub.f32 0.0, %v1724_v4  ;;  %v1988_v57 = vsel %vm1978_vm15, %v1948_v11, 0.0 }
 0x4a9   : > { %v2004_v25 = vadd.f32 %v1988_v57, %v1971_v36 }
 0x4aa   : > { %v2021_v24 = vsel %vm2011_vm4, %v1746_v60, 0.0 }
 0x4ab   : > { %v2037_v2 = vadd.f32 %v2021_v24, %v2004_v25 }
 0x4ad   : > { %2053 = vst [vmem:[%s3757_s19 + $0x48] sm:$0xff] %v2037_v2 }
 0x4ae   : > { %v1726_v54 = vpop.xlane.xlu2 %1725 }
 0x4af   : > { %v1950_v47 = vpop.xlane.xlu1 %1949  ;;  %v1747_v12 = vsub.f32 0.0, %v1726_v54 }
 0x4b0   : > { %v1989_v21 = vsel %vm1978_vm15, %v1950_v47, 0.0 }
 0x4b1   : > { %v2005_v52 = vadd.f32 %v1989_v21, %v1972_v62  ;;  %v2022_v40 = vsel %vm2011_vm4, %v1747_v12, 0.0 }
 0x4b3   : > { %v2038_v46 = vadd.f32 %v2022_v40, %v2005_v52 }
 0x4b5   : > { %2054 = vst [vmem:[%s3757_s19 + $0x50] sm:$0xff] %v2038_v46 }
 0x4b6   : > { %v1952_v61 = vpop.xlane.xlu2 %1951  ;;  %v1728_v9 = vpop.xlane.xlu0 %1727 }
 0x4b7   : > { %v1990_v19 = vsel %vm1978_vm15, %v1952_v61, 0.0  ;;  %v1748_v33 = vsub.f32 0.0, %v1728_v9 }
 0x4b8   : > { %v2006_v28 = vadd.f32 %v1990_v19, %v1973_v50 }
 0x4b9   : > { %v2023_v16 = vsel %vm2011_vm4, %v1748_v33, 0.0 }
 0x4ba   : > { %v2039_v18 = vadd.f32 %v2023_v16, %v2006_v28 }
 0x4bc   : > { %2055 = vst [vmem:[%s3757_s19 + $0x58] sm:$0xff] %v2039_v18 }
 0x4be   : > { %v1730_v29 = vpop.xlane.xlu1 %1729  ;;  %v1954_v45 = vpop.xlane.xlu0 %1953 }
 0x4bf   : > { %v1749_v41 = vsub.f32 0.0, %v1730_v29  ;;  %v1991_v7 = vsel %vm1978_vm15, %v1954_v45, 0.0 }
 0x4c0   : > { %v2007_v3 = vadd.f32 %v1991_v7, %v1974_v38 }
 0x4c1   : > { %v2024_v26 = vsel %vm2011_vm4, %v1749_v41, 0.0 }
 0x4c2   : > { %v2040_v10 = vadd.f32 %v2024_v26, %v2007_v3 }
 0x4c4   : > { %2056 = vst [vmem:[%s3757_s19 + $0x60] sm:$0xff] %v2040_v10 }
 0x4c6   : > { %v1732_v55 = vpop.xlane.xlu2 %1731 }
 0x4c7   : > { %v1750_v43 = vsub.f32 0.0, %v1732_v55 }
 0x4c9   : > { %v2025_v5 = vsel %vm2011_vm4, %v1750_v43, 0.0 }
 0x4ce   : > { %v1958_v37 = vpop.xlane.xlu2 %1957  ;;  %v1734_v22 = vpop.xlane.xlu0 %1733 }
 0x4cf   : > { %v1993_v58 = vsel %vm1978_vm15, %v1958_v37, 0.0  ;;  %v1751_v8 = vsub.f32 0.0, %v1734_v22 }
 0x4d0   : > { %v2009_v31 = vadd.f32 %v1993_v58, %v1976_v13 }
 0x4d1   : > { %v2026_v39 = vsel %vm2011_vm4, %v1751_v8, 0.0 }
 0x4d2   : > { %v2042_v42 = vadd.f32 %v2026_v39, %v2009_v31 }
 0x4d4   : > { %2058 = vst [vmem:[%s3757_s19 + $0x70] sm:$0xff] %v2042_v42 }
 0x4d6   : > { %v1736_v35 = vpop.xlane.xlu1 %1735  ;;  %v1960_v30 = vpop.xlane.xlu0 %1959 }
 0x4d7   : > { %v1752_v20 = vsub.f32 0.0, %v1736_v35  ;;  %v1994_v49 = vsel %vm1978_vm15, %v1960_v30, 0.0 }
 0x4d8   : > { %v2010_v0 = vadd.f32 %v1994_v49, %v1977_v53 }
 0x4d9   : > { %v2027_v34 = vsel %vm2011_vm4, %v1752_v20, 0.0 }
 0x4da   : > { %v2043_v32 = vadd.f32 %v2027_v34, %v2010_v0 }
 0x4dc   : > { %2059 = vst [vmem:[%s3757_s19 + $0x78] sm:$0xff] %v2043_v32 }
 0x4de   : > { %v1956_v63 = vpop.xlane.xlu1 %1955 }
 0x4df   : > { %v1992_v44 = vsel %vm1978_vm15, %v1956_v63, 0.0 }
 0x4e0   : > { %v2008_v1 = vadd.f32 %v1992_v44, %v1975_v14 }
 0x4e2   : > { %v2041_v15 = vadd.f32 %v2025_v5, %v2008_v1 }
 0x4e4   : > { %2057 = vst [vmem:[%s3757_s19 + $0x68] sm:$0xff] %v2041_v15 }
 0x4e5   : > { %2566 = shalt.err (!%p2563_p3)
}
 0x4e6   : > { %s2605_s16 = smov 128   ;;  %s2606_s19 = smov 8  }
 0x4e7   : > { %2325 = dma.vmem_to_hbm [thread:$0]  (%p2710_p5), %s2074_s28, 2048, %s2076_s15, %s2061_s25, %s2605_s16, %s2605_s16, %s2606_s19  }
 0x4e8 PF: > { %p2331_p4 = scmp.ge.s32.totalorder %s2601_s24, 2  ;;  %s2090_s26 = sand.u32 1, %s2589_s21  }
 0x4e9   : > { %s2091_s0 = scalar_lea.sflag [#allocation3], %s2090_s26 }
 0x4ea   : > { %p2328_p7 = pnand %p2331_p4, %p2714_p6 }
 0x4ec   : > { %p2329_p8 = pneg %p2328_p7 }
 0x4ee   : > { %2584 = dma.done.wait (%p2329_p8), %s2091_s0, 2048  }
 0x4ef   : > { %2586 = vsyncadd (%p2329_p8), %s2091_s0, 4294965248  ;;  %p22_p9 = scmp.ge.s32.totalorder %s2697_s27, 4   ;;  %s4119_s21 = smov %s2593_s22 }
 0x4f0   : > { %s4120_s22 = smov %s2597_s23  ;;  %s4121_s23 = smov %s2708_s30 }
 0x4f1   : > { %s4122_s24 = smov %s2697_s27  ;;  %24 = sbr.rel (!%p22_p9) target bundleno = 6 (0x6), region = 106 }
 0x4f6   :  { %2097 = vsyncpa [#allocation3], 1 }
 0x4f7   :  { %2099 = vsyncpa [#allocation3 + $0x1], 1 }

</bundles_post_ra>
